<compile_context>
chip_gen: v7x
topology: tpu7x:2x2x1
jax: 0.10.0
libtpu: 0.0.40
codegen_flags: <defaults>
</compile_context>

<pallas_src>
import functools

import jax
import jax.numpy as jnp
from jax.experimental import pallas as pl
from jax.experimental.pallas import tpu as pltpu

LEAKY_SLOPE = 0.01   # nn.LeakyReLU default negative_slope
_NEG = -1e30         # effectively -inf for padded action lanes (exp underflows to 0)


def _leaky_relu(x):
    return jnp.where(x > 0, x, LEAKY_SLOPE * x)


def _round_up(x, m):
    return -(-x // m) * m


def a2c_kernel(x_ref, mask_ref,
               w1_ref, b1_ref, w2_ref, b2_ref, w3_ref, b3_ref,
               out_ref, *, n_actions):
    head = pl.program_id(0)          # 0 = actor, 1 = critic
    x = x_ref[...]                   # [TB, S] f32

    # 3-layer MLP for the current head: bf16 x bf16 on the MXU with f32
    # accumulation; all element-wise math stays f32 (v5e has no bf16 VPU/EUP).
    h1 = _leaky_relu(
        jnp.dot(x.astype(jnp.bfloat16), w1_ref[...],
                preferred_element_type=jnp.float32) + b1_ref[...])
    h2 = _leaky_relu(
        jnp.dot(h1.astype(jnp.bfloat16), w2_ref[...],
                preferred_element_type=jnp.float32) + b2_ref[...])
    y = jnp.dot(h2.astype(jnp.bfloat16), w3_ref[...],
                preferred_element_type=jnp.float32) + b3_ref[...]    # [TB, PADA]

    @pl.when(head == 0)
    def _actor():
        lane = jax.lax.broadcasted_iota(jnp.int32, y.shape, 1)
        valid = lane < n_actions
        # policy = actor(x) * mask (exactly the PyTorch semantics);
        # lane-pad columns are forced to ~-inf so they vanish from the softmax.
        logits = jnp.where(valid, y * mask_ref[...], _NEG)
        m = jnp.max(logits, axis=-1, keepdims=True)
        z = logits - m
        e = jnp.exp(z)                                        # single EUP exp pass
        lse = jnp.log(jnp.sum(e, axis=-1, keepdims=True))
        logprobs = z - lse
        # logits -> lanes [0, PADA), logprobs -> lanes [PADA, 2*PADA): both halves
        # are 128-lane aligned, so this is one full-width unmasked store.
        out_ref[...] = jnp.concatenate([logits, logprobs], axis=-1)

    @pl.when(head == 1)
    def _critic():
        # Column 0 of y is the value (critic W3/B3 are zero-padded past column 0).
        out_ref[...] = jnp.concatenate([y, jnp.zeros_like(y)], axis=-1)


def _is_v7x():
    try:
        kind = jax.devices()[0].device_kind.lower()
    except Exception:
        return False
    return ("v7" in kind) or ("tpu7" in kind)


def _batch_tile(batch):
    # 256 rows fills the v6e/v7x MXU once weights are VMEM-resident; 128 already
    # saturates v5e.  Small batches run as a single 8-row-aligned tile.
    return _round_up(batch, 8) if batch <= 256 else 256


@functools.partial(jax.jit, static_argnames=("use_core_parallel",))
def a2c_forward(x, mask, packed, use_core_parallel=False):
    """x: [B, S] f32, mask: [B, A] f32, packed: output of pack_params."""
    B, S = x.shape
    A = mask.shape[-1]
    H1 = packed["W1"].shape[-1]
    H2 = packed["W2"].shape[-1]
    PADA = packed["W3"].shape[-1]        # action dim lane-padded to a 128 multiple
    OUT = 2 * PADA

    TB = _batch_tile(B)
    n_bt = _round_up(B, TB) // TB
    B_pad = n_bt * TB

    x_p = jnp.pad(x, ((0, B_pad - B), (0, 0)))
    mask_p = jnp.pad(mask, ((0, B_pad - B), (0, PADA - A)))

    def per_head(shape):    # selected by head index; batch-invariant, so the
        # weight blocks stay VMEM-resident across all batch tiles of a head.
        return pl.BlockSpec((None,) + shape, lambda h, b: (h,) + (0,) * len(shape))

    def per_batch(shape):   # activation tiles streamed along the batch axis
        return pl.BlockSpec(shape, lambda h, b: (b,) + (0,) * (len(shape) - 1))

    head_sem = pltpu.CORE_PARALLEL if use_core_parallel else pltpu.PARALLEL

    cost = pl.CostEstimate(
        flops=int(4 * B_pad * (S * H1 + H1 * H2 + H2 * PADA)),   # 2 heads, 2/MAC
        transcendentals=int(B_pad * (PADA + 1)),                 # exp + log
        bytes_accessed=int(
            sum(v.size * v.dtype.itemsize for v in packed.values())
            + x_p.size * 4 + mask_p.size * 4 + 2 * B_pad * OUT * 4),
    )

    out = pl.pallas_call(
        functools.partial(a2c_kernel, n_actions=A),
        out_shape=jax.ShapeDtypeStruct((2, B_pad, OUT), jnp.float32),
        grid=(2, n_bt),                   # head outer, batch tile inner
        in_specs=[
            per_batch((TB, S)),           # x
            per_batch((TB, PADA)),        # mask (lane-padded)
            per_head((S, H1)),  per_head((1, H1)),     # W1 (bf16), B1 (f32)
            per_head((H1, H2)), per_head((1, H2)),     # W2 (bf16), B2 (f32)
            per_head((H2, PADA)), per_head((1, PADA)), # W3 (bf16), B3 (f32)
        ],
        out_specs=pl.BlockSpec((None, TB, OUT), lambda h, b: (h, b, 0)),
        compiler_params=pltpu.CompilerParams(
            dimension_semantics=(head_sem, pltpu.ARBITRARY)),
        cost_estimate=cost,
    )(x_p, mask_p,
      packed["W1"], packed["B1"],
      packed["W2"], packed["B2"],
      packed["W3"], packed["B3"])

    logits = out[0, :B, :A]
    logprobs = out[0, :B, PADA:PADA + A]
    values = out[1, :B, 0]               # torch.squeeze(values): [B, 1] -> [B]
    return logits, logprobs, values


def pack_params(p, len_action_space):
    """Stack actor/critic weights head-major, lane-pad the final layer to a
    multiple of 128 lanes, and cast weights to bf16 (all done once)."""
    A = len_action_space
    PADA = _round_up(max(A, 1), 128)
    w3a = jnp.pad(p["w3a"], ((0, 0), (0, PADA - A)))
    b3a = jnp.pad(p["b3a"], ((0, 0), (0, PADA - A)))
    w3c = jnp.pad(p["w3c"], ((0, 0), (0, PADA - 1)))
    b3c = jnp.pad(p["b3c"], ((0, 0), (0, PADA - 1)))
    return dict(
        W1=jnp.stack([p["w1a"], p["w1c"]]).astype(jnp.bfloat16),
        B1=jnp.stack([p["b1a"], p["b1c"]]),
        W2=jnp.stack([p["w2a"], p["w2c"]]).astype(jnp.bfloat16),
        B2=jnp.stack([p["b2a"], p["b2c"]]),
        W3=jnp.stack([w3a, w3c]).astype(jnp.bfloat16),
        B3=jnp.stack([b3a, b3c]),
    )


def init_params(key, state_size, len_action_space):
    """Deterministic init matching nn.Linear's default U(-1/sqrt(fan_in), +...)."""
    def linear(key, fan_in, fan_out):
        kw, kb = jax.random.split(key)
        bound = 1.0 / jnp.sqrt(fan_in)
        w = jax.random.uniform(kw, (fan_in, fan_out), jnp.float32, -bound, bound)
        b = jax.random.uniform(kb, (1, fan_out), jnp.float32, -bound, bound)
        return w, b

    keys = jax.random.split(key, 6)
    w1a, b1a = linear(keys[0], state_size, 1024)
    w2a, b2a = linear(keys[1], 1024, 512)
    w3a, b3a = linear(keys[2], 512, len_action_space)
    w1c, b1c = linear(keys[3], state_size, 1024)
    w2c, b2c = linear(keys[4], 1024, 512)
    w3c, b3c = linear(keys[5], 512, 1)
    return dict(
        w1a=w1a, b1a=b1a, w2a=w2a, b2a=b2a, w3a=w3a, b3a=b3a,
        w1c=w1c, b1c=b1c, w2c=w2c, b2c=b2c, w3c=w3c, b3c=b3c,
    )


def _reference(x, mask, p):
    """Pure-JAX f32 reference (weights already bf16-rounded by the caller)."""
    def head(w1, b1, w2, b2, w3, b3):
        h = x @ w1 + b1
        h = jnp.where(h > 0, h, LEAKY_SLOPE * h)
        h = h @ w2 + b2
        h = jnp.where(h > 0, h, LEAKY_SLOPE * h)
        return h @ w3 + b3

    logits = head(p["w1a"], p["b1a"], p["w2a"], p["b2a"], p["w3a"], p["b3a"]) * mask
    logprobs = jax.nn.log_softmax(logits, axis=-1)
    values = jnp.squeeze(
        head(p["w1c"], p["b1c"], p["w2c"], p["b2c"], p["w3c"], p["b3c"]), axis=-1)
    return logits, logprobs, values


if __name__ == "__main__":
    B, STATE_SIZE, N_ACTIONS = 8, 32, 16

    key = jax.random.PRNGKey(0)
    kx, km, kp = jax.random.split(key, 3)

    x = jax.random.normal(kx, (B, STATE_SIZE), jnp.float32)
    mask = (jax.random.uniform(km, (B, N_ACTIONS)) > 0.2).astype(jnp.float32)
    params = init_params(kp, STATE_SIZE, N_ACTIONS)

    packed = pack_params(params, N_ACTIONS)   # one-time bf16 cast + stack + lane-pad

    try:
        outs = a2c_forward(x, mask, packed, use_core_parallel=_is_v7x())
        jax.block_until_ready(outs)
    except Exception:
        # TODO(synk): CORE_PARALLEL head split only applies to multi-TensorCore
        # chips; fall back to the single-core schedule if the compiler rejects it.
        outs = a2c_forward(x, mask, packed, use_core_parallel=False)
        jax.block_until_ready(outs)
    logits, logprobs, values = outs

    # Reference uses the same bf16-rounded weights (upcast to f32); remaining
    # difference is only the in-kernel bf16 activation casts -> loose tolerance.
    ref_p = {k: (v.astype(jnp.bfloat16).astype(jnp.float32) if k.startswith("w") else v)
             for k, v in params.items()}
    ref_logits, ref_logprobs, ref_values = _reference(x, mask, ref_p)

    assert logits.shape == (B, N_ACTIONS)
    assert logprobs.shape == (B, N_ACTIONS)
    assert values.shape == (B,)
    assert jnp.allclose(logits, ref_logits, atol=2e-2, rtol=2e-2)
    assert jnp.allclose(logprobs, ref_logprobs, atol=2e-2, rtol=2e-2)
    assert jnp.allclose(values, ref_values, atol=2e-2, rtol=2e-2)

    print("KERNEL_OK")
</pallas_src>

<mosaic_0001>
module attributes {stable_mosaic.version = 11 : i64} {
  func.func @a2c_kernel(%arg0: i32, %arg1: i32, %arg2: memref<8x32xf32, #tpu.memory_space<vmem>>, %arg3: memref<8x128xf32, #tpu.memory_space<vmem>>, %arg4: memref<1x32x1024xbf16, #tpu.memory_space<vmem>>, %arg5: memref<1x1x1024xf32, #tpu.memory_space<vmem>>, %arg6: memref<1x1024x512xbf16, #tpu.memory_space<vmem>>, %arg7: memref<1x1x512xf32, #tpu.memory_space<vmem>>, %arg8: memref<1x512x128xbf16, #tpu.memory_space<vmem>>, %arg9: memref<1x1x128xf32, #tpu.memory_space<vmem>>, %arg10: memref<1x8x256xf32, #tpu.memory_space<vmem>>) attributes {dimension_semantics = [#tpu.dimension_semantics<parallel>, #tpu.dimension_semantics<arbitrary>], iteration_bounds = array<i64: 2, 1>, scalar_prefetch = 0 : i64, scratch_operands = 0 : i64, tpu.core_type = #tpu.core_type<tc>, window_params = [{transform_indices = @transform_0, window_bounds = array<i64: 8, 32>}, {transform_indices = @transform_1, window_bounds = array<i64: 8, 128>}, {transform_indices = @transform_2, window_bounds = array<i64: 1, 32, 1024>}, {transform_indices = @transform_3, window_bounds = array<i64: 1, 1, 1024>}, {transform_indices = @transform_4, window_bounds = array<i64: 1, 1024, 512>}, {transform_indices = @transform_5, window_bounds = array<i64: 1, 1, 512>}, {transform_indices = @transform_6, window_bounds = array<i64: 1, 512, 128>}, {transform_indices = @transform_7, window_bounds = array<i64: 1, 1, 128>}, {transform_indices = @transform_8, window_bounds = array<i64: 1, 8, 256>}]} {
    %c0 = arith.constant 0 : index
    %c0_0 = arith.constant 0 : index
    %0 = vector.load %arg2[%c0, %c0_0] : memref<8x32xf32, #tpu.memory_space<vmem>>, vector<8x32xf32>
    %1 = arith.truncf %0 : vector<8x32xf32> to vector<8x32xbf16>
    %c0_1 = arith.constant 0 : index
    %c0_2 = arith.constant 0 : index
    %c0_3 = arith.constant 0 : index
    %2 = vector.load %arg4[%c0_1, %c0_2, %c0_3] : memref<1x32x1024xbf16, #tpu.memory_space<vmem>>, vector<1x32x1024xbf16>
    %3 = vector.shape_cast %2 : vector<1x32x1024xbf16> to vector<32x1024xbf16>
    %cst = arith.constant dense<0.000000e+00> : vector<8x1024xf32>
    %4 = tpu.matmul %1, %3, %cst {dimension_numbers = #tpu.dot_dimension_numbers<[1], [0], [0], [1], [0, 0, 1, 1], [], []>} : vector<8x32xbf16>, vector<32x1024xbf16>, vector<8x1024xf32> -> vector<8x1024xf32>
    %c0_4 = arith.constant 0 : index
    %c0_5 = arith.constant 0 : index
    %c0_6 = arith.constant 0 : index
    %5 = vector.load %arg5[%c0_4, %c0_5, %c0_6] : memref<1x1x1024xf32, #tpu.memory_space<vmem>>, vector<1x1x1024xf32>
    %6 = vector.shape_cast %5 : vector<1x1x1024xf32> to vector<1x1024xf32>
    %7 = vector.broadcast %6 : vector<1x1024xf32> to vector<8x1024xf32>
    %8 = arith.addf %4, %7 : vector<8x1024xf32>
    %cst_7 = arith.constant 0.000000e+00 : f32
    %9 = vector.broadcast %cst_7 : f32 to vector<8x1024xf32>
    %10 = arith.cmpf ogt, %8, %9 : vector<8x1024xf32>
    %cst_8 = arith.constant 0.00999999977 : f32
    %11 = vector.broadcast %cst_8 : f32 to vector<8x1024xf32>
    %12 = arith.mulf %11, %8 : vector<8x1024xf32>
    %13 = arith.select %10, %8, %12 : vector<8x1024xi1>, vector<8x1024xf32>
    %14 = arith.truncf %13 : vector<8x1024xf32> to vector<8x1024xbf16>
    %c0_9 = arith.constant 0 : index
    %c0_10 = arith.constant 0 : index
    %c0_11 = arith.constant 0 : index
    %15 = vector.load %arg6[%c0_9, %c0_10, %c0_11] : memref<1x1024x512xbf16, #tpu.memory_space<vmem>>, vector<1x1024x512xbf16>
    %16 = vector.shape_cast %15 : vector<1x1024x512xbf16> to vector<1024x512xbf16>
    %cst_12 = arith.constant dense<0.000000e+00> : vector<8x512xf32>
    %17 = tpu.matmul %14, %16, %cst_12 {dimension_numbers = #tpu.dot_dimension_numbers<[1], [0], [0], [1], [0, 0, 1, 1], [], []>} : vector<8x1024xbf16>, vector<1024x512xbf16>, vector<8x512xf32> -> vector<8x512xf32>
    %c0_13 = arith.constant 0 : index
    %c0_14 = arith.constant 0 : index
    %c0_15 = arith.constant 0 : index
    %18 = vector.load %arg7[%c0_13, %c0_14, %c0_15] : memref<1x1x512xf32, #tpu.memory_space<vmem>>, vector<1x1x512xf32>
    %19 = vector.shape_cast %18 : vector<1x1x512xf32> to vector<1x512xf32>
    %20 = vector.broadcast %19 : vector<1x512xf32> to vector<8x512xf32>
    %21 = arith.addf %17, %20 : vector<8x512xf32>
    %cst_16 = arith.constant 0.000000e+00 : f32
    %22 = vector.broadcast %cst_16 : f32 to vector<8x512xf32>
    %23 = arith.cmpf ogt, %21, %22 : vector<8x512xf32>
    %cst_17 = arith.constant 0.00999999977 : f32
    %24 = vector.broadcast %cst_17 : f32 to vector<8x512xf32>
    %25 = arith.mulf %24, %21 : vector<8x512xf32>
    %26 = arith.select %23, %21, %25 : vector<8x512xi1>, vector<8x512xf32>
    %27 = arith.truncf %26 : vector<8x512xf32> to vector<8x512xbf16>
    %c0_18 = arith.constant 0 : index
    %c0_19 = arith.constant 0 : index
    %c0_20 = arith.constant 0 : index
    %28 = vector.load %arg8[%c0_18, %c0_19, %c0_20] : memref<1x512x128xbf16, #tpu.memory_space<vmem>>, vector<1x512x128xbf16>
    %29 = vector.shape_cast %28 : vector<1x512x128xbf16> to vector<512x128xbf16>
    %cst_21 = arith.constant dense<0.000000e+00> : vector<8x128xf32>
    %30 = tpu.matmul %27, %29, %cst_21 {dimension_numbers = #tpu.dot_dimension_numbers<[1], [0], [0], [1], [0, 0, 1, 1], [], []>} : vector<8x512xbf16>, vector<512x128xbf16>, vector<8x128xf32> -> vector<8x128xf32>
    %c0_22 = arith.constant 0 : index
    %c0_23 = arith.constant 0 : index
    %c0_24 = arith.constant 0 : index
    %31 = vector.load %arg9[%c0_22, %c0_23, %c0_24] : memref<1x1x128xf32, #tpu.memory_space<vmem>>, vector<1x1x128xf32>
    %32 = vector.shape_cast %31 : vector<1x1x128xf32> to vector<1x128xf32>
    %33 = vector.broadcast %32 : vector<1x128xf32> to vector<8x128xf32>
    %34 = arith.addf %30, %33 : vector<8x128xf32>
    %c0_i32 = arith.constant 0 : i32
    %35 = arith.cmpi eq, %arg0, %c0_i32 : i32
    %36 = arith.extui %35 : i1 to i32
    %c0_i32_25 = arith.constant 0 : i32
    %37 = arith.cmpi ne, %36, %c0_i32_25 : i32
    scf.if %37 {
      %41 = tpu.iota {dimensions = array<i32: 1>} : vector<8x128xi32>
      %c16_i32 = arith.constant 16 : i32
      %42 = vector.broadcast %c16_i32 : i32 to vector<8x128xi32>
      %43 = arith.cmpi slt, %41, %42 : vector<8x128xi32>
      %c0_27 = arith.constant 0 : index
      %c0_28 = arith.constant 0 : index
      %44 = vector.load %arg3[%c0_27, %c0_28] : memref<8x128xf32, #tpu.memory_space<vmem>>, vector<8x128xf32>
      %45 = arith.mulf %34, %44 : vector<8x128xf32>
      %cst_29 = arith.constant -1.000000e+30 : f32
      %46 = vector.broadcast %cst_29 : f32 to vector<8x128xf32>
      %47 = arith.select %43, %45, %46 : vector<8x128xi1>, vector<8x128xf32>
      %cst_30 = arith.constant dense<0xFF800000> : vector<8xf32>
      %48 = vector.multi_reduction <maximumf>, %47, %cst_30 [1] : vector<8x128xf32> to vector<8xf32>
      %49 = vector.shape_cast %48 : vector<8xf32> to vector<8x1xf32>
      %50 = vector.broadcast %49 : vector<8x1xf32> to vector<8x128xf32>
      %51 = arith.subf %47, %50 : vector<8x128xf32>
      %52 = math.exp %51 : vector<8x128xf32>
      %cst_31 = arith.constant dense<0.000000e+00> : vector<8xf32>
      %53 = vector.multi_reduction <add>, %52, %cst_31 [1] : vector<8x128xf32> to vector<8xf32>
      %54 = vector.shape_cast %53 : vector<8xf32> to vector<8x1xf32>
      %55 = math.log %54 : vector<8x1xf32>
      %56 = vector.broadcast %55 : vector<8x1xf32> to vector<8x128xf32>
      %57 = arith.subf %51, %56 : vector<8x128xf32>
      %58 = tpu.concatenate %47, %57 in 1 : vector<8x128xf32>, vector<8x128xf32> -> vector<8x256xf32>
      %c0_32 = arith.constant 0 : index
      %c0_33 = arith.constant 0 : index
      %c0_34 = arith.constant 0 : index
      %59 = vector.load %arg10[%c0_32, %c0_33, %c0_34] : memref<1x8x256xf32, #tpu.memory_space<vmem>>, vector<1x8x256xf32>
      %60 = vector.shape_cast %59 : vector<1x8x256xf32> to vector<8x256xf32>
      %61 = vector.shape_cast %58 : vector<8x256xf32> to vector<1x8x256xf32>
      tpu.vector_store %arg10[%c0_32, %c0_33, %c0_34], %61 {strides = array<i32>} : memref<1x8x256xf32, #tpu.memory_space<vmem>>, vector<1x8x256xf32>,
    } else {
    }
    %c1_i32 = arith.constant 1 : i32
    %38 = arith.cmpi eq, %arg0, %c1_i32 : i32
    %39 = arith.extui %38 : i1 to i32
    %c0_i32_26 = arith.constant 0 : i32
    %40 = arith.cmpi ne, %39, %c0_i32_26 : i32
    scf.if %40 {
      %cst_27 = arith.constant 0.000000e+00 : f32
      %41 = vector.broadcast %cst_27 : f32 to vector<8x128xf32>
      %42 = tpu.concatenate %34, %41 in 1 : vector<8x128xf32>, vector<8x128xf32> -> vector<8x256xf32>
      %c0_28 = arith.constant 0 : index
      %c0_29 = arith.constant 0 : index
      %c0_30 = arith.constant 0 : index
      %43 = vector.load %arg10[%c0_28, %c0_29, %c0_30] : memref<1x8x256xf32, #tpu.memory_space<vmem>>, vector<1x8x256xf32>
      %44 = vector.shape_cast %43 : vector<1x8x256xf32> to vector<8x256xf32>
      %45 = vector.shape_cast %42 : vector<8x256xf32> to vector<1x8x256xf32>
      tpu.vector_store %arg10[%c0_28, %c0_29, %c0_30], %45 {strides = array<i32>} : memref<1x8x256xf32, #tpu.memory_space<vmem>>, vector<1x8x256xf32>,
    } else {
    }
    return
  }
  func.func @transform_0(%arg0: i32, %arg1: i32) -> (i32, i32) {
    %c0_i32 = arith.constant 0 : i32
    %c0_i32_0 = arith.constant 0 : i32
    return %arg1, %c0_i32 : i32, i32
  }
  func.func @transform_1(%arg0: i32, %arg1: i32) -> (i32, i32) {
    %c0_i32 = arith.constant 0 : i32
    %c0_i32_0 = arith.constant 0 : i32
    return %arg1, %c0_i32 : i32, i32
  }
  func.func @transform_2(%arg0: i32, %arg1: i32) -> (i32, i32, i32) {
    %c0_i32 = arith.constant 0 : i32
    %c0_i32_0 = arith.constant 0 : i32
    %c0_i32_1 = arith.constant 0 : i32
    return %arg0, %c0_i32, %c0_i32_0 : i32, i32, i32
  }
  func.func @transform_3(%arg0: i32, %arg1: i32) -> (i32, i32, i32) {
    %c0_i32 = arith.constant 0 : i32
    %c0_i32_0 = arith.constant 0 : i32
    %c0_i32_1 = arith.constant 0 : i32
    return %arg0, %c0_i32, %c0_i32_0 : i32, i32, i32
  }
  func.func @transform_4(%arg0: i32, %arg1: i32) -> (i32, i32, i32) {
    %c0_i32 = arith.constant 0 : i32
    %c0_i32_0 = arith.constant 0 : i32
    %c0_i32_1 = arith.constant 0 : i32
    return %arg0, %c0_i32, %c0_i32_0 : i32, i32, i32
  }
  func.func @transform_5(%arg0: i32, %arg1: i32) -> (i32, i32, i32) {
    %c0_i32 = arith.constant 0 : i32
    %c0_i32_0 = arith.constant 0 : i32
    %c0_i32_1 = arith.constant 0 : i32
    return %arg0, %c0_i32, %c0_i32_0 : i32, i32, i32
  }
  func.func @transform_6(%arg0: i32, %arg1: i32) -> (i32, i32, i32) {
    %c0_i32 = arith.constant 0 : i32
    %c0_i32_0 = arith.constant 0 : i32
    %c0_i32_1 = arith.constant 0 : i32
    return %arg0, %c0_i32, %c0_i32_0 : i32, i32, i32
  }
  func.func @transform_7(%arg0: i32, %arg1: i32) -> (i32, i32, i32) {
    %c0_i32 = arith.constant 0 : i32
    %c0_i32_0 = arith.constant 0 : i32
    %c0_i32_1 = arith.constant 0 : i32
    return %arg0, %c0_i32, %c0_i32_0 : i32, i32, i32
  }
  func.func @transform_8(%arg0: i32, %arg1: i32) -> (i32, i32, i32) {
    %c0_i32 = arith.constant 0 : i32
    %c0_i32_0 = arith.constant 0 : i32
    return %arg0, %arg1, %c0_i32 : i32, i32, i32
  }
}

</mosaic_0001>

<bundles_post_ra>
// kernel: a2c_forward.1
= control target key start
LH: loop header
LB: loop body
LE: loop exit
PB: predicated region body
PF: predicated region fallthrough
CT: control target
= control target key end

     0   :  { %s5398_s0 = inlined_call_operand.hbm [shape: f32[8,32], index: 0, kind: input, shape index: {}]   ;;  %s5399_s1 = inlined_call_operand.vmem [shape: f32[8,128], index: 1, kind: input, shape index: {}]   ;;  %s5400_s2 = inlined_call_operand.hbm [shape: bf16[2,32,1024], index: 2, kind: input, shape index: {}]   ;;  %s5401_s3 = inlined_call_operand.hbm [shape: f32[2,1,1024], index: 3, kind: input, shape index: {}]   ;;  %s5402_s4 = inlined_call_operand.hbm [shape: bf16[2,1024,512], index: 4, kind: input, shape index: {}]   ;;  %s5403_s5 = inlined_call_operand.hbm [shape: f32[2,1,512], index: 5, kind: input, shape index: {}]   ;;  %s5404_s6 = inlined_call_operand.hbm [shape: bf16[2,512,128], index: 6, kind: input, shape index: {}]   ;;  %s5405_s7 = inlined_call_operand.hbm [shape: f32[2,1,128], index: 7, kind: input, shape index: {}]   ;;  %s5406_s8 = inlined_call_operand.vmem [shape: f32[2,8,256], index: 8, kind: output, shape index: {}]  }
   0x1   :  { %5421 = sst [smem:[#allocation20_spill]] %s5399_s1 }
   0x2   :  { %5422 = sst [smem:[#allocation21_spill]] %s5400_s2 }
   0x3   :  { %5423 = sst [smem:[#allocation22_spill]] %s5402_s4 }
   0x4   :  { %5424 = sst [smem:[#allocation23_spill]] %s5404_s6 }
   0x5   :  { %13 = vsyncpa [#allocation3], 0 }
   0x6   :  { %14 = vsyncpa [#allocation5], 0 }
   0x7   :  { %16 = vsyncpa [#allocation5 + $0x1], 0 }
   0x8   :  { %17 = vsyncpa [#allocation8], 0 }
   0x9   :  { %19 = vsyncpa [#allocation8 + $0x1], 0 }
   0xa   :  { %20 = vsyncpa [#allocation11], 0 }
   0xb   :  { %22 = vsyncpa [#allocation11 + $0x1], 0  ;;  %s4680_s27 = smov 0   ;;  %s4682_s28 = smov 0  }
   0xc   :  { %s4684_s29 = smov 0   ;;  %s4686_s30 = smov 0  }
   0xd   :  { %s4688_s9 = smov 0   ;;  %s4690_s10 = smov 0  }
   0xe LB: > { %5425 = sst [smem:[#allocation17_spill]] %s4606_s29  ;;  %s40_s11 = sadd.s32 1, %s4614_s9  ;;  %s4618_s10 = sphi %s4690_s10, %s28_s10   ;;  %s4614_s9 = sphi %s4688_s9, %s5455_s9   ;;  %s4610_s30 = sphi %s4686_s30, %s5454_s30   ;;  %s4606_s29 = sphi %s4684_s29, %s5450_s29   ;;  %s4602_s28 = sphi %s4682_s28, %s5453_s28   ;;  %s4598_s27 = sphi %s4680_s27, %s5452_s27  }
   0xf   : > { %s99_s12 = sadd.s32 1, %s4606_s29  ;;  %p42_p0 = scmp.ge.s32.totalorder %s40_s11, 2 }
  0x10   : > { %p106_p1 = scmp.ne.s32.totalorder %s4606_s29, %s4602_s28  ;;  %p107_p2 = scmp.eq.s32.totalorder %s4618_s10, 0 }
  0x11   : > { %s5457_s11 = smov (%p42_p0, %s40_s11), 0  ;;  %p3869_p4 = scmp.lt.s32.totalorder %s4618_s10, 2 }
  0x12   : > { %5426 = sst [smem:[#allocation18_spill]] %s5457_s11  ;;  %p108_p3 = por %p107_p2, %p106_p1 }
  0x13   : > { %s96_s13 = ssub.s32 %s4614_s9, %s5457_s11  ;;  %s4721_s14 = sand.u32 1, %s4618_s10  }
  0x14   : > { %p97_p5 = scmp.eq.s32.totalorder %s96_s13, 0  ;;  %s4724_s15 = sand.u32 1, %s4606_s29  }
  0x15   : > { %s3751_s16 = sshll.u32 %s4614_s9, 11  ;;  %s3413_s18 = sshll.u32 %s4724_s15, 7 }
  0x16   : > { %s4728_s17 = scalar_select %p97_p5, %s4606_s29, %s99_s12  }
  0x17   : > { %s5428_s2 = sld [smem:[#allocation21_spill]]  ;;  %p4736_p6 = pnand %p3869_p4, %p108_p3 }
  0x18   : > { %5427 = sst [smem:[#allocation19_spill]] %s4728_s17  ;;  %s318_s23 = scalar_lea.vmem [#allocation4], %s3413_s18 }
  0x19   : > { %s5429_s22 = scalar_select %p4736_p6, 1, 0 }
  0x1a   : > { %s325_s24 = sshll.u32 %s318_s23, 4  ;;  %s5409_s25 = scalar_lea.sflag [#allocation5], %s4721_s14  ;;  %s4740_s24 = int_to_ptr.vmem [resolvable:$true] %s325_s24 }
  0x1b   : > { %p4747_p8 = pneg %p4736_p6 }
  0x1d   : > { %s4734_s21 = scalar_lea.hbm %s5428_s2, %s3751_s16  ;;  %s4353_s19 = scalar_lea.hbm %s5428_s2, 4096 }
  0x1e   : > { %s4348_s26 = scalar_lea.hbm %s4734_s21, 2048  ;;  %p4354_p11 = scmp.lt.u32.totalorder %s4734_s21, %s5428_s2 }
  0x1f   : > { %p4349_p7 = scmp.ne.s32.totalorder %s4734_s21, %s4348_s26  ;;  %p4355_p12 = scmp.lt.u32.totalorder %s4353_s19, %s4348_s26 }
  0x20   : > { %s5430_s12 = scalar_select %p4747_p8, 1, 0 }
  0x21   : > { %p4351_p9 = pnand %p4747_p8, %p4349_p7  ;;  %p4356_p13 = por %p4355_p12, %p4354_p11 }
  0x22   : > { %p4357_p0 = scmp.lt.u32.totalorder %s4348_s26, %s4734_s21 }
  0x23   : > { %p4352_p10 = pneg %p4351_p9 }
  0x24   : > { %p4358_p1 = por %p4357_p0, %p4356_p13 }
  0x26   : > { %p4359_p2 = pnand %p4358_p1, %p4352_p10 }
  0x28   : > { %4362 = shalt.err (!%p4359_p2)
}
  0x29   : > { %s4363_s23 = scalar_lea.vmem %s4740_s24, 2048  ;;  %s4620_s13 = smov [#allocation4]  }
  0x2a   : > { %p4364_p3 = scmp.ne.s32.totalorder %s4740_s24, %s4363_s23  ;;  %s4368_s16 = sshll.u32 %s4620_s13, 4  ;;  %s4369_s16 = int_to_ptr.vmem [resolvable:$false] %s4368_s16 }
  0x2b   : > { %s4370_s18 = scalar_lea.vmem %s4369_s16, 4096  ;;  %p4371_p7 = scmp.lt.s32.totalorder %s4740_s24, %s4369_s16 }
  0x2c   : > { %p4366_p4 = pnand %p4364_p3, %p4747_p8  ;;  %p4372_p9 = scmp.lt.s32.totalorder %s4370_s18, %s4363_s23 }
  0x2e   : > { %p4367_p5 = pneg %p4366_p4  ;;  %p4373_p11 = por %p4372_p9, %p4371_p7 }
  0x30   : > { %p4374_p12 = pnand %p4373_p11, %p4367_p5 }
  0x32   : > { %4377 = shalt.err (!%p4374_p12)
}
  0x33   : > { %s4621_s26 = smov 512   ;;  %s4622_s19 = smov 32  }
  0x34   : > { %3852 = dma.hbm_to_vmem [thread:$0]  (!%p4736_p6), %s4734_s21, 2048, %s4740_s24, %s5409_s25, %s4621_s26, %s4621_s26, %s4622_s19  }
  0x35   : > { %s3419_s20 = sshll.u32 %s4724_s15, 11  ;;  %s3753_s13 = sshll.u32 %s4614_s9, 15 }
  0x36   : > { %s5431_s4 = sld [smem:[#allocation22_spill]]  ;;  %s358_s2 = scalar_lea.vmem [#allocation7], %s3419_s20 }
  0x37   : > { %s365_s11 = sshll.u32 %s358_s2, 4  ;;  %s5412_s17 = scalar_lea.sflag [#allocation8], %s4721_s14  ;;  %s4779_s11 = int_to_ptr.vmem [resolvable:$true] %s365_s11 }
  0x3c   : > { %s4777_s18 = scalar_lea.hbm %s5431_s4, %s3753_s13  ;;  %s4383_s26 = scalar_lea.hbm %s5431_s4, 65536 }
  0x3d   : > { %s4378_s29 = scalar_lea.hbm %s4777_s18, 32768  ;;  %p4384_p1 = scmp.lt.u32.totalorder %s4777_s18, %s5431_s4 }
  0x3e   : > { %p4379_p10 = scmp.ne.s32.totalorder %s4777_s18, %s4378_s29  ;;  %p4385_p2 = scmp.lt.u32.totalorder %s4383_s26, %s4378_s29 }
  0x3f   : > { %p4387_p4 = scmp.lt.u32.totalorder %s4378_s29, %s4777_s18 }
  0x40   : > { %p4381_p13 = pnand %p4379_p10, %p4747_p8  ;;  %p4386_p3 = por %p4385_p2, %p4384_p1 }
  0x42   : > { %p4382_p0 = pneg %p4381_p13  ;;  %p4388_p5 = por %p4387_p4, %p4386_p3 }
  0x44   : > { %p4389_p7 = pnand %p4388_p5, %p4382_p0 }
  0x46   : > { %4392 = shalt.err (!%p4389_p7)
}
  0x47   : > { %s4393_s2 = scalar_lea.vmem %s4779_s11, 32768  ;;  %s4623_s20 = smov [#allocation7]  }
  0x48   : > { %p4394_p9 = scmp.ne.s32.totalorder %s4779_s11, %s4393_s2  ;;  %s4398_s16 = sshll.u32 %s4623_s20, 4  ;;  %s4399_s16 = int_to_ptr.vmem [resolvable:$false] %s4398_s16 }
  0x49   : > { %s4400_s23 = scalar_lea.vmem %s4399_s16, 65536  ;;  %p4401_p10 = scmp.lt.s32.totalorder %s4779_s11, %s4399_s16 }
  0x4a   : > { %p4396_p11 = pnand %p4394_p9, %p4747_p8  ;;  %p4402_p13 = scmp.lt.s32.totalorder %s4400_s23, %s4393_s2 }
  0x4c   : > { %p4397_p12 = pneg %p4396_p11  ;;  %p4403_p1 = por %p4402_p13, %p4401_p10 }
  0x4e   : > { %p4404_p2 = pnand %p4403_p1, %p4397_p12 }
  0x50   : > { %4407 = shalt.err (!%p4404_p2)
}
  0x51   : > { %s4624_s29 = smov 256   ;;  %s4625_s21 = smov 16  }
  0x52   : > { %3858 = dma.hbm_to_vmem [thread:$0]  (!%p4736_p6), %s4777_s18, 32768, %s4779_s11, %s5412_s17, %s4624_s29, %s4624_s29, %s4625_s21  }
  0x53   : > { %s3425_s24 = sshll.u32 %s4724_s15, 8  ;;  %s3755_s26 = sshll.u32 %s4614_s9, 12 }
  0x54   : > { %s5432_s6 = sld [smem:[#allocation23_spill]]  ;;  %s398_s20 = scalar_lea.vmem [#allocation10], %s3425_s24 }
  0x55   : > { %s405_s16 = sshll.u32 %s398_s20, 4  ;;  %s5411_s23 = scalar_lea.sflag [#allocation11], %s4721_s14  ;;  %s4812_s16 = int_to_ptr.vmem [resolvable:$true] %s405_s16 }
  0x5a   : > { %s4810_s2 = scalar_lea.hbm %s5432_s6, %s3755_s26  ;;  %s4413_s29 = scalar_lea.hbm %s5432_s6, 8192 }
  0x5b   : > { %s4408_s25 = scalar_lea.hbm %s4810_s2, 4096  ;;  %p4414_p5 = scmp.lt.u32.totalorder %s4810_s2, %s5432_s6 }
  0x5c   : > { %p4409_p0 = scmp.ne.s32.totalorder %s4810_s2, %s4408_s25  ;;  %p4415_p7 = scmp.lt.u32.totalorder %s4413_s29, %s4408_s25 }
  0x5d   : > { %p4417_p11 = scmp.lt.u32.totalorder %s4408_s25, %s4810_s2 }
  0x5e   : > { %p4411_p3 = pnand %p4409_p0, %p4747_p8  ;;  %p4416_p9 = por %p4415_p7, %p4414_p5 }
  0x60   : > { %p4412_p4 = pneg %p4411_p3  ;;  %p4418_p12 = por %p4417_p11, %p4416_p9 }
  0x62   : > { %p4419_p10 = pnand %p4418_p12, %p4412_p4 }
  0x64   : > { %4422 = shalt.err (!%p4419_p10)
}
  0x65   : > { %s4423_s24 = scalar_lea.vmem %s4812_s16, 4096  ;;  %s4626_s19 = smov [#allocation10]  }
  0x66   : > { %p4424_p13 = scmp.ne.s32.totalorder %s4812_s16, %s4423_s24  ;;  %s4428_s13 = sshll.u32 %s4626_s19, 4  ;;  %s4429_s13 = int_to_ptr.vmem [resolvable:$false] %s4428_s13 }
  0x67   : > { %s4430_s20 = scalar_lea.vmem %s4429_s13, 8192  ;;  %p4431_p0 = scmp.lt.s32.totalorder %s4812_s16, %s4429_s13 }
  0x68   : > { %p4426_p1 = pnand %p4424_p13, %p4747_p8  ;;  %p4432_p3 = scmp.lt.s32.totalorder %s4430_s20, %s4423_s24 }
  0x6a   : > { %p4427_p2 = pneg %p4426_p1  ;;  %p4433_p5 = por %p4432_p3, %p4431_p0 }
  0x6c   : > { %p4434_p7 = pnand %p4433_p5, %p4427_p2 }
  0x6e   : > { %4437 = shalt.err (!%p4434_p7)
}
  0x6f   : > { %s4627_s25 = smov 64   ;;  %s4628_s11 = smov 4  }
  0x70   : > { %3864 = dma.hbm_to_vmem [thread:$0]  (!%p4736_p6), %s4810_s2, 4096, %s4812_s16, %s5411_s23, %s4627_s25, %s4627_s25, %s4628_s11  }
  0x71   : > { %s5410_s18 = sadd.s32 4294967295, %s4618_s10   ;;  %p112_p4 = scmp.ne.s32.totalorder %s4602_s28, %s4598_s27 }
  0x72   : > { %p4843_p9 = scmp.eq.s32.totalorder %s5410_s18, 0  ;;  %p3409_p11 = scmp.ge.s32.totalorder %s4618_s10, 1 }
  0x73   : > { %p281_p12 = scmp.lt.s32.totalorder %s4618_s10, 3  ;;  %s4629_s27 = smov [#allocation2]  }
  0x74   : > { %s5433_s29 = scalar_select %p4843_p9, 1, 0 }
  0x75   : > { %p4851_p10 = por %p4843_p9, %p112_p4  ;;  %p4855_p13 = pnand %p3409_p11, %p281_p12 }
  0x76   : > { %s296_s2 = sshll.u32 %s4629_s27, 4  ;;  %s3416_s16 = sshll.u32 %s4724_s15, 3  ;;  %s297_s2 = int_to_ptr.vmem [resolvable:$true] %s296_s2 }
  0x77   : > { %s5434_s21 = scalar_select %p4851_p10, 1, 0 }
  0x78   : > { %s5435_s26 = scalar_select %p4855_p13, 1, 0 }
  0x79   : > { %p3845_p1 = pneg %p4855_p13  ;;  %s3752_s24 = sshll.u32 %s4614_s9, 7 }
  0x7a   : > { %s4872_s25 = scalar_lea.hbm %s5401_s3, %s3752_s24  ;;  %s339_s11 = scalar_lea.vmem [#allocation6], %s3416_s16 }
  0x7b   : > { %p4865_p2 = pnand %p3845_p1, %p4843_p9  ;;  %s347_s18 = sshll.u32 %s339_s11, 4  ;;  %s4875_s18 = int_to_ptr.vmem [resolvable:$true] %s347_s18 }
  0x7c   : > { %s3422_s23 = sshll.u32 %s4724_s15, 2  ;;  %s4438_s4 = scalar_lea.hbm %s5398_s0, 128 }
  0x7d   : > { %p4439_p0 = scmp.ne.s32.totalorder %s5398_s0, %s4438_s4  ;;  %p4440_p3 = pneg %p4865_p2 }
  0x7e   : > { %p4445_p4 = scmp.lt.u32.totalorder %s4438_s4, %s5398_s0 }
  0x7f   : > { %p4441_p5 = pnand %p4440_p3, %p4439_p0 }
  0x81   : > { %p4442_p7 = pneg %p4441_p5 }
  0x83   : > { %p4447_p11 = pnand %p4445_p4, %p4442_p7 }
  0x85   : > { %4450 = shalt.err (!%p4447_p11)
}
  0x86   : > { %s4451_s16 = scalar_lea.vmem %s297_s2, 128  ;;  %p4459_p9 = scmp.lt.s32.totalorder %s297_s2, %s297_s2 }
  0x87   : > { %p4452_p12 = scmp.ne.s32.totalorder %s297_s2, %s4451_s16  ;;  %p4460_p13 = scmp.lt.s32.totalorder %s4451_s16, %s4451_s16 }
  0x89   : > { %p4454_p1 = pnand %p4452_p12, %p4440_p3  ;;  %p4461_p6 = por %p4460_p13, %p4459_p9 }
  0x8b   : > { %p4455_p10 = pneg %p4454_p1 }
  0x8d   : > { %p4462_p8 = pnand %p4461_p6, %p4455_p10 }
  0x8f   : > { %4465 = shalt.err (!%p4462_p8)
}
  0x90   : > { %3848 = dma.hbm_to_vmem [thread:$0]  (!%p4865_p2), %s5398_s0, 128, %s297_s2, [#allocation3]  }
  0x91   : > { %s4466_s4 = scalar_lea.hbm %s4872_s25, 128  ;;  %p5437_p3 = scmp.ne.s32.totalorder %s5430_s12, 0 }
  0x92   : > { %p4467_p0 = scmp.ne.s32.totalorder %s4872_s25, %s4466_s4  ;;  %s4471_s11 = scalar_lea.hbm %s5401_s3, 256 }
  0x93   : > { %p4472_p6 = scmp.lt.u32.totalorder %s4872_s25, %s5401_s3  ;;  %p4473_p8 = scmp.lt.u32.totalorder %s4471_s11, %s4466_s4 }
  0x94   : > { %p4469_p5 = pnand %p4467_p0, %p5437_p3  ;;  %p4475_p10 = scmp.lt.u32.totalorder %s4466_s4, %s4872_s25 }
  0x95   : > { %p4474_p9 = por %p4473_p8, %p4472_p6 }
  0x96   : > { %p4470_p7 = pneg %p4469_p5 }
  0x97   : > { %p4476_p13 = por %p4475_p10, %p4474_p9 }
  0x99   : > { %p4477_p4 = pnand %p4476_p13, %p4470_p7 }
  0x9b   : > { %4480 = shalt.err (!%p4477_p4)
}
  0x9c   : > { %s4481_s2 = scalar_lea.vmem %s4875_s18, 128  ;;  %s4630_s13 = smov [#allocation6]  }
  0x9d   : > { %p4482_p2 = scmp.ne.s32.totalorder %s4875_s18, %s4481_s2  ;;  %s4486_s24 = sshll.u32 %s4630_s13, 4  ;;  %s4487_s24 = int_to_ptr.vmem [resolvable:$false] %s4486_s24 }
  0x9e   : > { %s4488_s16 = scalar_lea.vmem %s4487_s24, 256  ;;  %p4489_p1 = scmp.lt.s32.totalorder %s4875_s18, %s4487_s24 }
  0x9f   : > { %p4484_p11 = pnand %p4482_p2, %p5437_p3  ;;  %p4490_p0 = scmp.lt.s32.totalorder %s4488_s16, %s4481_s2 }
  0xa1   : > { %p4485_p12 = pneg %p4484_p11  ;;  %p4491_p5 = por %p4490_p0, %p4489_p1 }
  0xa3   : > { %p4492_p6 = pnand %p4491_p5, %p4485_p12 }
  0xa5   : > { %4495 = shalt.err (!%p4492_p6)
}
  0xa6   : > { %p5438_p7 = scmp.ne.s32.totalorder %s5429_s22, 0  ;;  %s5439_s1 = scalar_lea.sflag [#allocation5], %s4721_s14 }
  0xa7   : > { %s3754_s6 = sshll.u32 %s4614_s9, 6  ;;  %s379_s11 = scalar_lea.vmem [#allocation9], %s3422_s23 }
  0xa8   : > { %3855 = dma.hbm_to_vmem [thread:$0]  (!%p5438_p7), %s4872_s25, 128, %s4875_s18, %s5439_s1  }
  0xa9   : > { %s4920_s20 = scalar_lea.hbm %s5403_s5, %s3754_s6  ;;  %s387_s27 = sshll.u32 %s379_s11, 4  ;;  %s388_s27 = int_to_ptr.vmem [resolvable:$true] %s387_s27 }
  0xaa   : > { %s4496_s19 = scalar_lea.hbm %s4920_s20, 64  ;;  %s4501_s2 = scalar_lea.hbm %s5403_s5, 128 }
  0xab   : > { %p4497_p8 = scmp.ne.s32.totalorder %s4920_s20, %s4496_s19  ;;  %p4502_p13 = scmp.lt.u32.totalorder %s4920_s20, %s5403_s5 }
  0xac   : > { %p4503_p4 = scmp.lt.u32.totalorder %s4501_s2, %s4496_s19  ;;  %p4505_p11 = scmp.lt.u32.totalorder %s4496_s19, %s4920_s20 }
  0xad   : > { %p4499_p9 = pnand %p4497_p8, %p5437_p3 }
  0xae   : > { %p4504_p2 = por %p4503_p4, %p4502_p13 }
  0xaf   : > { %p4500_p10 = pneg %p4499_p9 }
  0xb0   : > { %p4506_p12 = por %p4505_p11, %p4504_p2 }
  0xb2   : > { %p4507_p1 = pnand %p4506_p12, %p4500_p10 }
  0xb4   : > { %4510 = shalt.err (!%p4507_p1)
}
  0xb5   : > { %s4511_s23 = scalar_lea.vmem %s388_s27, 64  ;;  %s4631_s16 = smov [#allocation9]  }
  0xb6   : > { %p4512_p0 = scmp.ne.s32.totalorder %s388_s27, %s4511_s23  ;;  %s4516_s1 = sshll.u32 %s4631_s16, 4  ;;  %s4517_s1 = int_to_ptr.vmem [resolvable:$false] %s4516_s1 }
  0xb7   : > { %s4518_s6 = scalar_lea.vmem %s4517_s1, 128  ;;  %p4519_p8 = scmp.lt.s32.totalorder %s388_s27, %s4517_s1 }
  0xb8   : > { %p4514_p5 = pnand %p4512_p0, %p5437_p3  ;;  %p4520_p9 = scmp.lt.s32.totalorder %s4518_s6, %s4511_s23 }
  0xba   : > { %p4515_p6 = pneg %p4514_p5  ;;  %p4521_p7 = por %p4520_p9, %p4519_p8 }
  0xbc   : > { %p4522_p4 = pnand %p4521_p7, %p4515_p6 }
  0xbe   : > { %4525 = shalt.err (!%p4522_p4)
}
  0xbf   : > { %p5440_p13 = scmp.ne.s32.totalorder %s5429_s22, 0  ;;  %s5441_s4 = scalar_lea.sflag [#allocation8], %s4721_s14 }
  0xc0   : > { %s3428_s17 = sshll.u32 %s4614_s9, 4  ;;  %s418_s11 = scalar_lea.vmem [#allocation12], %s4724_s15 }
  0xc1   : > { %3861 = dma.hbm_to_vmem [thread:$0]  (!%p5440_p13), %s4920_s20, 64, %s388_s27, %s5441_s4  }
  0xc2   : > { %s425_s19 = sshll.u32 %s418_s11, 4  ;;  %s423_s2 = scalar_lea.hbm %s5405_s7, %s3428_s17  ;;  %s426_s19 = int_to_ptr.vmem [resolvable:$true] %s425_s19 }
  0xc3   : > { %s4526_s13 = scalar_lea.hbm %s423_s2, 16  ;;  %s4531_s16 = scalar_lea.hbm %s5405_s7, 32 }
  0xc4   : > { %p4527_p7 = scmp.ne.s32.totalorder %s423_s2, %s4526_s13  ;;  %p4532_p11 = scmp.lt.u32.totalorder %s423_s2, %s5405_s7 }
  0xc5   : > { %p4533_p12 = scmp.lt.u32.totalorder %s4531_s16, %s4526_s13  ;;  %p4535_p0 = scmp.lt.u32.totalorder %s4526_s13, %s423_s2 }
  0xc6   : > { %p4529_p10 = pnand %p4527_p7, %p5437_p3 }
  0xc7   : > { %p4534_p1 = por %p4533_p12, %p4532_p11 }
  0xc8   : > { %p4530_p2 = pneg %p4529_p10 }
  0xc9   : > { %p4536_p5 = por %p4535_p0, %p4534_p1 }
  0xcb   : > { %p4537_p6 = pnand %p4536_p5, %p4530_p2 }
  0xcd   : > { %4540 = shalt.err (!%p4537_p6)
}
  0xce   : > { %s4541_s15 = scalar_lea.vmem %s426_s19, 16  ;;  %s4632_s20 = smov [#allocation12]  }
  0xcf   : > { %p4542_p8 = scmp.ne.s32.totalorder %s426_s19, %s4541_s15  ;;  %s4546_s27 = sshll.u32 %s4632_s20, 4  ;;  %s4547_s27 = int_to_ptr.vmem [resolvable:$false] %s4546_s27 }
  0xd0   : > { %s4548_s4 = scalar_lea.vmem %s4547_s27, 32  ;;  %p4549_p7 = scmp.lt.s32.totalorder %s426_s19, %s4547_s27 }
  0xd1   : > { %p4544_p9 = pnand %p4542_p8, %p5437_p3  ;;  %p4550_p10 = scmp.lt.s32.totalorder %s4548_s4, %s4541_s15 }
  0xd3   : > { %p4545_p4 = pneg %p4544_p9  ;;  %p4551_p13 = por %p4550_p10, %p4549_p7 }
  0xd5   : > { %p4552_p11 = pnand %p4551_p13, %p4545_p4 }
  0xd7   : > { %4555 = shalt.err (!%p4552_p11)
}
  0xd8   : > { %p5442_p12 = scmp.ne.s32.totalorder %s5429_s22, 0  ;;  %s5443_s17 = scalar_lea.sflag [#allocation11], %s4721_s14 }
  0xd9   : > { %p5444_p2 = scmp.ne.s32.totalorder %s5435_s26, 0 }
  0xda   : > { %3867 = dma.hbm_to_vmem [thread:$0]  (!%p5442_p12), %s423_s2, 16, %s426_s19, %s5443_s17  }
  0xdb   : > { %434 = sbr.rel (%p5444_p2) target bundleno = 1433 (0x599), region = 52  ;;  %p5445_p3 = scmp.ne.s32.totalorder (!%p5444_p2), %s5433_s29, 0 }
  0xe2   : > { %4581 = dma.done.wait (%p5445_p3), [#allocation3], 128  }
  0xe3   : > { %4583 = vsyncadd (%p5445_p3), [#allocation3], 4294967168  ;;  %s5446_s12 = sadd.s32 4294967295, %s4618_s10   ;;  %s4971_s18 = sand.u32 1, %s4602_s28  }
  0xe4   : > { %s440_s11 = sand.u32 1, %s5446_s12   ;;  %s3431_s22 = sshll.u32 %s4971_s18, 7 }
  0xe5   : > { %s441_s14 = scalar_lea.sflag [#allocation5], %s440_s11  ;;  %s4974_s19 = scalar_lea.vmem [#allocation4], %s3431_s22 }
  0xe6   : > { %p5447_p13 = scmp.ne.s32.totalorder %s5434_s21, 0 }
  0xe8   : > { %4585 = dma.done.wait (%p5447_p13), %s441_s14, 2176  }
  0xe9   : > { %4587 = vsyncadd (%p5447_p13), %s441_s14, 4294965120  ;;  %s3432_s29 = sshll.u32 %s4971_s18, 3  ;;  %s3433_s26 = sshll.u32 %s4971_s18, 11 }
  0xea   : > { %s4982_s25 = scalar_lea.vmem [#allocation6], %s3432_s29  ;;  %s459_s2 = scalar_lea.sflag [#allocation8], %s440_s11 }
  0xeb   : > { %s4984_s13 = scalar_lea.vmem [#allocation7], %s3433_s26 }
  0xec   : > { %4589 = dma.done.wait (%p5447_p13), %s459_s2, 32832  }
  0xed   : > { %4591 = vsyncadd (%p5447_p13), %s459_s2, 4294934464  ;;  %s3434_s24 = sshll.u32 %s4971_s18, 2  ;;  %s3435_s23 = sshll.u32 %s4971_s18, 8 }
  0xee   : > { %s4992_s16 = scalar_lea.vmem [#allocation9], %s3434_s24  ;;  %s477_s1 = scalar_lea.sflag [#allocation11], %s440_s11 }
  0xef   : > { %s4994_s6 = scalar_lea.vmem [#allocation10], %s3435_s23 }
  0xf0   : > { %4593 = dma.done.wait (%p5447_p13), %s477_s1, 4112  }
  0xf1   : > { %4595 = vsyncadd (%p5447_p13), %s477_s1, 4294963184  ;;  %p557_p1 = scmp.lt.s32.totalorder %s4610_s30, 1  ;;  %v4633_v0 = vmov 0   ;;  %v569_v1 = vld [vmem:[%s4974_s19] sm:$0xff]  ;;  %v570_v7 = vld [vmem:[%s4974_s19 + $0x8] sm:$0xff]  ;;  %vm707_vm0 = vcmask 261120  }
  0xf2   : > { %743 = vmatprep.mubr.bf16.mxu0 %v4633_v0  ;;  %784 = vmatprep.mubr.bf16.mxu1 %v4633_v0  ;;  %v573_v2 = vld [vmem:[%s4974_s19 + $0x20] sm:$0xff]  ;;  %v574_v9 = vld [vmem:[%s4974_s19 + $0x28] sm:$0xff]  ;;  %v571_v15 = vld [vmem:[%s4974_s19 + $0x10] sm:$0xff]  ;;  %s488_s17 = scalar_lea.vmem [#allocation12], %s4971_s18  ;;  %p3747_p0 = scmp.ne.s32.totalorder %s4610_s30, 0 }
  0xf3   : > { %s558_s15 = scalar_select %p557_p1, %s4610_s30, 1  ;;  %v577_v3 = vld [vmem:[%s4974_s19 + $0x40] sm:$0xff]  ;;  %v3439_v4 = vcombine.high %v569_v1, %v573_v2  ;;  %v3438_v5 = vcombine.low %v569_v1, %v573_v2  ;;  %v578_v10 = vld [vmem:[%s4974_s19 + $0x48] sm:$0xff]  ;;  %v3441_v12 = vcombine.high %v570_v7, %v574_v9  ;;  %v3440_v13 = vcombine.low %v570_v7, %v574_v9  ;;  %v575_v16 = vld [vmem:[%s4974_s19 + $0x30] sm:$0xff] }
  0xf4   : > { %v581_v6 = vld [vmem:[%s4974_s19 + $0x60] sm:$0xff]  ;;  %v582_v11 = vld [vmem:[%s4974_s19 + $0x68] sm:$0xff]  ;;  %v567_v18 = vld [vmem:[#allocation2] sm:$0xff]  ;;  %v3443_v21 = vcombine.high %v571_v15, %v575_v16  ;;  %v3442_v28 = vcombine.low %v571_v15, %v575_v16  ;;  %s5448_s18 = sld [smem:[#allocation20_spill]] (!%p3747_p0) }
  0xf5   : > { %s3756_s20 = sshll.u32 %s558_s15, 4  ;;  %v3447_v8 = vcombine.high %v577_v3, %v581_v6  ;;  %711 = vmatprep.subr.bf16.mxu0 %v3439_v4  ;;  %v3449_v14 = vcombine.high %v578_v10, %v582_v11  ;;  %v3446_v17 = vcombine.low %v577_v3, %v581_v6  ;;  %v572_v19 = vld [vmem:[%s4974_s19 + $0x18] sm:$0xff]  ;;  %752 = vmatprep.subr.bf16.mxu1 %v3441_v12  ;;  %v579_v23 = vld [vmem:[%s4974_s19 + $0x50] sm:$0xff] }
  0xf6   : > { %s5005_s21 = scalar_lea.vmem %s5406_s8, %s3756_s20  ;;  %712 = vmatpush1.bf16.msra.mxu0 %v3438_v5  ;;  %v576_v20 = vld [vmem:[%s4974_s19 + $0x38] sm:$0xff]  ;;  %753 = vmatpush1.bf16.msra.mxu1 %v3440_v13  ;;  %v3448_v22 = vcombine.low %v578_v10, %v582_v11  ;;  %v583_v24 = vld [vmem:[%s4974_s19 + $0x70] sm:$0xff]  ;;  %v568_v25 = vpack.c.bf16 %v567_v18, %v567_v18 }
  0xf7   : > { %713 = vmatprep.subr.bf16.mxu0 %v3447_v8  ;;  %754 = vmatprep.subr.bf16.mxu1 %v3449_v14  ;;  %v3445_v26 = vcombine.high %v572_v19, %v576_v20  ;;  %v580_v27 = vld [vmem:[%s4974_s19 + $0x58] sm:$0xff]  ;;  %v3451_v30 = vcombine.high %v579_v23, %v583_v24  ;;  %v3444_v31 = vcombine.low %v572_v19, %v576_v20  ;;  %v3930_v34 = vld [vmem:[%s4984_s13 + $0x4] ss:$16 sps:$4 sm:$0xff]   ;;  %v3928_v37 = vld [vmem:[%s4984_s13] ss:$16 sps:$4 sm:$0xff]  }
  0xf8   : > { %v584_v29 = vld [vmem:[%s4974_s19 + $0x78] sm:$0xff]  ;;  %v3450_v33 = vcombine.low %v579_v23, %v583_v24  ;;  %v3936_v38 = vld [vmem:[%s4984_s13 + $0x24] ss:$16 sps:$4 sm:$0xff]   ;;  %v3934_v41 = vld [vmem:[%s4984_s13 + $0x20] ss:$16 sps:$4 sm:$0xff]  }
  0xf9   : > { %v3453_v32 = vcombine.high %v580_v27, %v584_v29  ;;  %v3452_v35 = vcombine.low %v580_v27, %v584_v29  ;;  %v3933_v36 = vld [vmem:[%s4984_s13 + $0xc] ss:$16 sps:$4 sm:$0xff]   ;;  %v3931_v39 = vld [vmem:[%s4984_s13 + $0x8] ss:$16 sps:$4 sm:$0xff]   ;;  %v3942_v42 = vld [vmem:[%s4984_s13 + $0x44] ss:$16 sps:$4 sm:$0xff]  }
  0xfa   : > { %714 = vmatpush1.bf16.msra.mxu0 %v3446_v17  ;;  %755 = vmatpush1.bf16.msra.mxu1 %v3448_v22  ;;  %v3939_v40 = vld [vmem:[%s4984_s13 + $0x2c] ss:$16 sps:$4 sm:$0xff]   ;;  %v3937_v43 = vld [vmem:[%s4984_s13 + $0x28] ss:$16 sps:$4 sm:$0xff]   ;;  %v3940_v45 = vld [vmem:[%s4984_s13 + $0x40] ss:$16 sps:$4 sm:$0xff]  }
  0xfb   : > { %793 = vmatprep.subr.bf16.mxu0 %v3443_v21  ;;  %834 = vmatprep.subr.bf16.mxu1 %v3445_v26  ;;  %v3945_v44 = vld [vmem:[%s4984_s13 + $0x4c] ss:$16 sps:$4 sm:$0xff]   ;;  %v3948_v46 = vld [vmem:[%s4984_s13 + $0x64] ss:$16 sps:$4 sm:$0xff]   ;;  %v3943_v47 = vld [vmem:[%s4984_s13 + $0x48] ss:$16 sps:$4 sm:$0xff]  }
  0xfc   : > { %v3951_v48 = vld [vmem:[%s4984_s13 + $0x6c] ss:$16 sps:$4 sm:$0xff]   ;;  %v3946_v49 = vld [vmem:[%s4984_s13 + $0x60] ss:$16 sps:$4 sm:$0xff]   ;;  %v3954_v50 = vld [vmem:[%s4984_s13 + $0x84] ss:$16 sps:$4 sm:$0xff]  }
  0xfd   : > { %3454 = vmatmul.mubr.msk.bf16.vlgmr.msra.gmra.mrb[0].mxu0 %vm707_vm0, %v568_v25  ;;  %3455 = vmatmul.mubr.msk.bf16.vlgmr.msra.gmra.mrb[0].mxu1 %vm707_vm0, %v568_v25  ;;  %v3949_v51 = vld [vmem:[%s4984_s13 + $0x68] ss:$16 sps:$4 sm:$0xff]   ;;  %v3957_v52 = vld [vmem:[%s4984_s13 + $0x8c] ss:$16 sps:$4 sm:$0xff]   ;;  %v3952_v53 = vld [vmem:[%s4984_s13 + $0x80] ss:$16 sps:$4 sm:$0xff]  }
  0xfe   : > { %794 = vmatpush1.bf16.msra.mxu0 %v3442_v28  ;;  %825 = vmatprep.mubr.bf16.mxu0 %v4633_v0  ;;  %v3960_v54 = vld [vmem:[%s4984_s13 + $0xa4] ss:$16 sps:$4 sm:$0xff]   ;;  %v3955_v55 = vld [vmem:[%s4984_s13 + $0x88] ss:$16 sps:$4 sm:$0xff]   ;;  %v3963_v56 = vld [vmem:[%s4984_s13 + $0xac] ss:$16 sps:$4 sm:$0xff]  }
  0xff   : > { %795 = vmatprep.subr.bf16.mxu0 %v3451_v30  ;;  %835 = vmatpush1.bf16.msra.mxu1 %v3444_v31  ;;  %v3958_v57 = vld [vmem:[%s4984_s13 + $0xa0] ss:$16 sps:$4 sm:$0xff]   ;;  %v3966_v58 = vld [vmem:[%s4984_s13 + $0xc4] ss:$16 sps:$4 sm:$0xff]   ;;  %v3961_v59 = vld [vmem:[%s4984_s13 + $0xa8] ss:$16 sps:$4 sm:$0xff]  }
 0x100   : > { %866 = vmatprep.mubr.bf16.mxu1 %v4633_v0  ;;  %836 = vmatprep.subr.bf16.mxu1 %v3453_v32  ;;  %v3969_v60 = vld [vmem:[%s4984_s13 + $0xcc] ss:$16 sps:$4 sm:$0xff]   ;;  %v3964_v61 = vld [vmem:[%s4984_s13 + $0xc0] ss:$16 sps:$4 sm:$0xff]   ;;  %v3967_v62 = vld [vmem:[%s4984_s13 + $0xc8] ss:$16 sps:$4 sm:$0xff]  }
 0x101   : > { %v3972_v63 = vld [vmem:[%s4984_s13 + $0xe4] ss:$16 sps:$4 sm:$0xff]   ;;  %v3970_v0 = vld [vmem:[%s4984_s13 + $0xe0] ss:$16 sps:$4 sm:$0xff]   ;;  %v3975_v1 = vld [vmem:[%s4984_s13 + $0xec] ss:$16 sps:$4 sm:$0xff]  }
 0x102   : > { %796 = vmatpush1.bf16.msra.mxu0 %v3450_v33  ;;  %v3978_v2 = vld [vmem:[%s4984_s13 + $0x104] ss:$16 sps:$4 sm:$0xff]   ;;  %v3973_v3 = vld [vmem:[%s4984_s13 + $0xe8] ss:$16 sps:$4 sm:$0xff]   ;;  %v3981_v4 = vld [vmem:[%s4984_s13 + $0x10c] ss:$16 sps:$4 sm:$0xff]  }
 0x103   : > { %2465 = vmatprep.subr.bf16.mxu0 %v3930_v34  ;;  %837 = vmatpush1.bf16.msra.mxu1 %v3452_v35  ;;  %v3976_v5 = vld [vmem:[%s4984_s13 + $0x100] ss:$16 sps:$4 sm:$0xff]   ;;  %v3984_v6 = vld [vmem:[%s4984_s13 + $0x124] ss:$16 sps:$4 sm:$0xff]   ;;  %v3979_v7 = vld [vmem:[%s4984_s13 + $0x108] ss:$16 sps:$4 sm:$0xff]  }
 0x104   : > { %2629 = vmatprep.subr.bf16.mxu1 %v3933_v36  ;;  %v3987_v8 = vld [vmem:[%s4984_s13 + $0x12c] ss:$16 sps:$4 sm:$0xff]   ;;  %v3982_v9 = vld [vmem:[%s4984_s13 + $0x120] ss:$16 sps:$4 sm:$0xff]   ;;  %v3990_v10 = vld [vmem:[%s4984_s13 + $0x144] ss:$16 sps:$4 sm:$0xff]  }
 0x105   : > { %3456 = vmatmul.mubr.msk.bf16.vlgmr.msra.gmra.mrb[4].mxu0 %vm707_vm0, %v568_v25  ;;  %v3985_v11 = vld [vmem:[%s4984_s13 + $0x128] ss:$16 sps:$4 sm:$0xff]   ;;  %v3993_v12 = vld [vmem:[%s4984_s13 + $0x14c] ss:$16 sps:$4 sm:$0xff]   ;;  %v3988_v13 = vld [vmem:[%s4984_s13 + $0x140] ss:$16 sps:$4 sm:$0xff]  }
 0x106   : > { %2466 = vmatpush1.bf16.msra.mxu0 %v3928_v37  ;;  %3457 = vmatmul.mubr.msk.bf16.vlgmr.msra.gmra.mrb[4].mxu1 %vm707_vm0, %v568_v25  ;;  %v3996_v14 = vld [vmem:[%s4984_s13 + $0x164] ss:$16 sps:$4 sm:$0xff]   ;;  %v3991_v15 = vld [vmem:[%s4984_s13 + $0x148] ss:$16 sps:$4 sm:$0xff]   ;;  %v3999_v16 = vld [vmem:[%s4984_s13 + $0x16c] ss:$16 sps:$4 sm:$0xff]   ;;  %v587_v37 = vlaneseq }
 0x107   : > { %2467 = vmatprep.subr.bf16.mxu0 %v3936_v38  ;;  %2630 = vmatpush1.bf16.msra.mxu1 %v3931_v39  ;;  %v3994_v17 = vld [vmem:[%s4984_s13 + $0x160] ss:$16 sps:$4 sm:$0xff]   ;;  %v4002_v18 = vld [vmem:[%s4984_s13 + $0x184] ss:$16 sps:$4 sm:$0xff]   ;;  %v3997_v19 = vld [vmem:[%s4984_s13 + $0x168] ss:$16 sps:$4 sm:$0xff]  }
 0x108   : > { %2631 = vmatprep.subr.bf16.mxu1 %v3939_v40  ;;  %v4005_v20 = vld [vmem:[%s4984_s13 + $0x18c] ss:$16 sps:$4 sm:$0xff]   ;;  %v4000_v21 = vld [vmem:[%s4984_s13 + $0x180] ss:$16 sps:$4 sm:$0xff]   ;;  %v4008_v22 = vld [vmem:[%s4984_s13 + $0x1a4] ss:$16 sps:$4 sm:$0xff]  }
 0x109   : > { %v4003_v23 = vld [vmem:[%s4984_s13 + $0x188] ss:$16 sps:$4 sm:$0xff]   ;;  %v4011_v24 = vld [vmem:[%s4984_s13 + $0x1ac] ss:$16 sps:$4 sm:$0xff]   ;;  %v4006_v25 = vld [vmem:[%s4984_s13 + $0x1a0] ss:$16 sps:$4 sm:$0xff]  }
 0x10a   : > { %2468 = vmatpush1.bf16.msra.mxu0 %v3934_v41  ;;  %v4009_v26 = vld [vmem:[%s4984_s13 + $0x1a8] ss:$16 sps:$4 sm:$0xff]   ;;  %v4014_v27 = vld [vmem:[%s4984_s13 + $0x1c4] ss:$16 sps:$4 sm:$0xff]   ;;  %v4017_v28 = vld [vmem:[%s4984_s13 + $0x1cc] ss:$16 sps:$4 sm:$0xff]  }
 0x10b   : > { %2469 = vmatprep.subr.bf16.mxu0 %v3942_v42  ;;  %2632 = vmatpush1.bf16.msra.mxu1 %v3937_v43  ;;  %v4012_v29 = vld [vmem:[%s4984_s13 + $0x1c0] ss:$16 sps:$4 sm:$0xff]   ;;  %v4015_v30 = vld [vmem:[%s4984_s13 + $0x1c8] ss:$16 sps:$4 sm:$0xff]   ;;  %v4020_v31 = vld [vmem:[%s4984_s13 + $0x1e4] ss:$16 sps:$4 sm:$0xff]  }
 0x10c   : > { %2633 = vmatprep.subr.bf16.mxu1 %v3945_v44  ;;  %v4023_v32 = vld [vmem:[%s4984_s13 + $0x1ec] ss:$16 sps:$4 sm:$0xff]   ;;  %v4018_v33 = vld [vmem:[%s4984_s13 + $0x1e0] ss:$16 sps:$4 sm:$0xff]   ;;  %v4021_v34 = vld [vmem:[%s4984_s13 + $0x1e8] ss:$16 sps:$4 sm:$0xff]  }
 0x10d   : > { %v4026_v35 = vld [vmem:[%s4984_s13 + $0x204] ss:$16 sps:$4 sm:$0xff]   ;;  %v4029_v36 = vld [vmem:[%s4984_s13 + $0x20c] ss:$16 sps:$4 sm:$0xff]   ;;  %v5094_v38 = vshrl.u32 %v587_v37, 7 }
 0x10e   : > { %2470 = vmatpush1.bf16.msra.mxu0 %v3940_v45  ;;  %v5098_v40 = vld [vmem:[%s4982_s25] sm:$0xff] }
 0x10f   : > { %2471 = vmatprep.subr.bf16.mxu0 %v3948_v46  ;;  %2634 = vmatpush1.bf16.msra.mxu1 %v3943_v47  ;;  %v589_v39 = vsub.s32 0, %v5094_v38  ;;  %v593_v41 = vsub.s32 1, %v5094_v38  ;;  %v601_v42 = vsub.s32 3, %v5094_v38 }
 0x110   : > { %2635 = vmatprep.subr.bf16.mxu1 %v3951_v48 }
 0x111   : > { %v590_v43 = vrot.slane %v5098_v40, %v589_v39  ;;  %v594_v44 = vrot.slane %v5098_v40, %v593_v41  ;;  %v602_v46 = vrot.slane %v5098_v40, %v601_v42 }
 0x112   : > { %2472 = vmatpush1.bf16.msra.mxu0 %v3946_v49 }
 0x113   : > { %2473 = vmatprep.subr.bf16.mxu0 %v3954_v50  ;;  %2636 = vmatpush1.bf16.msra.mxu1 %v3949_v51 }
 0x114   : > { %2637 = vmatprep.subr.bf16.mxu1 %v3957_v52 }
 0x116   : > { %2474 = vmatpush1.bf16.msra.mxu0 %v3952_v53 }
 0x117   : > { %2475 = vmatprep.subr.bf16.mxu0 %v3960_v54  ;;  %2638 = vmatpush1.bf16.msra.mxu1 %v3955_v55 }
 0x118   : > { %2639 = vmatprep.subr.bf16.mxu1 %v3963_v56 }
 0x11a   : > { %2476 = vmatpush1.bf16.msra.mxu0 %v3958_v57 }
 0x11b   : > { %2477 = vmatprep.subr.bf16.mxu0 %v3966_v58  ;;  %2640 = vmatpush1.bf16.msra.mxu1 %v3961_v59 }
 0x11c   : > { %2641 = vmatprep.subr.bf16.mxu1 %v3969_v60 }
 0x11e   : > { %2478 = vmatpush1.bf16.msra.mxu0 %v3964_v61 }
 0x11f   : > { %2479 = vmatprep.subr.bf16.mxu0 %v3972_v63  ;;  %2642 = vmatpush1.bf16.msra.mxu1 %v3967_v62  ;;  %v4024_v63 = vld [vmem:[%s4984_s13 + $0x200] ss:$16 sps:$4 sm:$0xff]  }
 0x120   : > { %2643 = vmatprep.subr.bf16.mxu1 %v3975_v1 }
 0x122   : > { %2480 = vmatpush1.bf16.msra.mxu0 %v3970_v0  ;;  %v4027_v0 = vld [vmem:[%s4984_s13 + $0x208] ss:$16 sps:$4 sm:$0xff]  }
 0x123   : > { %2481 = vmatprep.subr.bf16.mxu0 %v3978_v2  ;;  %2644 = vmatpush1.bf16.msra.mxu1 %v3973_v3  ;;  %v4032_v2 = vld [vmem:[%s4984_s13 + $0x224] ss:$16 sps:$4 sm:$0xff]   ;;  %v4035_v3 = vld [vmem:[%s4984_s13 + $0x22c] ss:$16 sps:$4 sm:$0xff]  }
 0x124   : > { %2645 = vmatprep.subr.bf16.mxu1 %v3981_v4 }
 0x126   : > { %2482 = vmatpush1.bf16.msra.mxu0 %v3976_v5 }
 0x127   : > { %2483 = vmatprep.subr.bf16.mxu0 %v3984_v6  ;;  %2646 = vmatpush1.bf16.msra.mxu1 %v3979_v7 }
 0x128   : > { %2647 = vmatprep.subr.bf16.mxu1 %v3987_v8 }
 0x12a   : > { %2484 = vmatpush1.bf16.msra.mxu0 %v3982_v9  ;;  %v4030_v9 = vld [vmem:[%s4984_s13 + $0x220] ss:$16 sps:$4 sm:$0xff]  }
 0x12b   : > { %2485 = vmatprep.subr.bf16.mxu0 %v3990_v10  ;;  %2648 = vmatpush1.bf16.msra.mxu1 %v3985_v11  ;;  %v4033_v10 = vld [vmem:[%s4984_s13 + $0x228] ss:$16 sps:$4 sm:$0xff]  }
 0x12c   : > { %2649 = vmatprep.subr.bf16.mxu1 %v3993_v12  ;;  %v4038_v12 = vld [vmem:[%s4984_s13 + $0x244] ss:$16 sps:$4 sm:$0xff]  }
 0x12e   : > { %2486 = vmatpush1.bf16.msra.mxu0 %v3988_v13  ;;  %v4041_v13 = vld [vmem:[%s4984_s13 + $0x24c] ss:$16 sps:$4 sm:$0xff]  }
 0x12f   : > { %2487 = vmatprep.subr.bf16.mxu0 %v3996_v14  ;;  %2650 = vmatpush1.bf16.msra.mxu1 %v3991_v15  ;;  %v4036_v14 = vld [vmem:[%s4984_s13 + $0x240] ss:$16 sps:$4 sm:$0xff]   ;;  %v4039_v15 = vld [vmem:[%s4984_s13 + $0x248] ss:$16 sps:$4 sm:$0xff]  }
 0x130   : > { %2651 = vmatprep.subr.bf16.mxu1 %v3999_v16  ;;  %v4044_v16 = vld [vmem:[%s4984_s13 + $0x264] ss:$16 sps:$4 sm:$0xff]  }
 0x132   : > { %2488 = vmatpush1.bf16.msra.mxu0 %v3994_v17  ;;  %v4047_v17 = vld [vmem:[%s4984_s13 + $0x26c] ss:$16 sps:$4 sm:$0xff]  }
 0x133   : > { %2489 = vmatprep.subr.bf16.mxu0 %v4002_v18  ;;  %2652 = vmatpush1.bf16.msra.mxu1 %v3997_v19  ;;  %v4042_v18 = vld [vmem:[%s4984_s13 + $0x260] ss:$16 sps:$4 sm:$0xff]   ;;  %v4045_v19 = vld [vmem:[%s4984_s13 + $0x268] ss:$16 sps:$4 sm:$0xff]  }
 0x134   : > { %2653 = vmatprep.subr.bf16.mxu1 %v4005_v20  ;;  %v4050_v20 = vld [vmem:[%s4984_s13 + $0x284] ss:$16 sps:$4 sm:$0xff]  }
 0x136   : > { %2490 = vmatpush1.bf16.msra.mxu0 %v4000_v21  ;;  %v4053_v21 = vld [vmem:[%s4984_s13 + $0x28c] ss:$16 sps:$4 sm:$0xff]  }
 0x137   : > { %2491 = vmatprep.subr.bf16.mxu0 %v4008_v22  ;;  %2654 = vmatpush1.bf16.msra.mxu1 %v4003_v23  ;;  %v4048_v22 = vld [vmem:[%s4984_s13 + $0x280] ss:$16 sps:$4 sm:$0xff]   ;;  %v4051_v23 = vld [vmem:[%s4984_s13 + $0x288] ss:$16 sps:$4 sm:$0xff]  }
 0x138   : > { %2655 = vmatprep.subr.bf16.mxu1 %v4011_v24  ;;  %v4056_v24 = vld [vmem:[%s4984_s13 + $0x2a4] ss:$16 sps:$4 sm:$0xff]  }
 0x13a   : > { %2492 = vmatpush1.bf16.msra.mxu0 %v4006_v25  ;;  %v4059_v25 = vld [vmem:[%s4984_s13 + $0x2ac] ss:$16 sps:$4 sm:$0xff]  }
 0x13b   : > { %2656 = vmatpush1.bf16.msra.mxu1 %v4009_v26  ;;  %2493 = vmatprep.subr.bf16.mxu0 %v4014_v27  ;;  %v4054_v26 = vld [vmem:[%s4984_s13 + $0x2a0] ss:$16 sps:$4 sm:$0xff]   ;;  %v4057_v27 = vld [vmem:[%s4984_s13 + $0x2a8] ss:$16 sps:$4 sm:$0xff]  }
 0x13c   : > { %2657 = vmatprep.subr.bf16.mxu1 %v4017_v28 }
 0x13e   : > { %2494 = vmatpush1.bf16.msra.mxu0 %v4012_v29  ;;  %v4062_v29 = vld [vmem:[%s4984_s13 + $0x2c4] ss:$16 sps:$4 sm:$0xff]  }
 0x13f   : > { %2658 = vmatpush1.bf16.msra.mxu1 %v4015_v30  ;;  %2495 = vmatprep.subr.bf16.mxu0 %v4020_v31  ;;  %v4065_v30 = vld [vmem:[%s4984_s13 + $0x2cc] ss:$16 sps:$4 sm:$0xff]  }
 0x140   : > { %2659 = vmatprep.subr.bf16.mxu1 %v4023_v32 }
 0x142   : > { %2496 = vmatpush1.bf16.msra.mxu0 %v4018_v33 }
 0x143   : > { %2660 = vmatpush1.bf16.msra.mxu1 %v4021_v34  ;;  %2506 = vmatprep.subr.bf16.mxu0 %v4026_v35  ;;  %v4060_v34 = vld [vmem:[%s4984_s13 + $0x2c0] ss:$16 sps:$4 sm:$0xff]   ;;  %v4063_v35 = vld [vmem:[%s4984_s13 + $0x2c8] ss:$16 sps:$4 sm:$0xff]  }
 0x144   : > { %2670 = vmatprep.subr.bf16.mxu1 %v4029_v36  ;;  %v4068_v36 = vld [vmem:[%s4984_s13 + $0x2e4] ss:$16 sps:$4 sm:$0xff]  }
 0x1d0   : > { %v745_v45 = vpop.f32.mrb[0].mxu0  ;;  %v5111_v51 = vpop.f32.mrb[0].mxu1 }
 0x1d1   : > { %v746_v47 = vadd.f32 %v745_v45, %v590_v43  ;;  %v747_v48 = vpop.f32.mrb[1].mxu0  ;;  %v788_v54 = vpop.f32.mrb[1].mxu1  ;;  %v4071_v43 = vld [vmem:[%s4984_s13 + $0x2ec] ss:$16 sps:$4 sm:$0xff]   ;;  %v4069_v45 = vld [vmem:[%s4984_s13 + $0x2e8] ss:$16 sps:$4 sm:$0xff]  }
 0x1d2   : > { %v748_v49 = vadd.f32 %v747_v48, %v594_v44  ;;  %v749_v50 = vpop.f32.mrb[2].mxu0  ;;  %v789_v56 = vadd.f32 %v788_v54, %v602_v46  ;;  %v790_v57 = vpop.f32.mrb[2].mxu1  ;;  %v4066_v44 = vld [vmem:[%s4984_s13 + $0x2e0] ss:$16 sps:$4 sm:$0xff]   ;;  %v4074_v46 = vld [vmem:[%s4984_s13 + $0x304] ss:$16 sps:$4 sm:$0xff]  }
 0x1d3   : > { %vm875_vm1 = vcmp.gt.f32.partialorder %v746_v47, 0.0  ;;  %v883_v52 = vmul.f32 0.01, %v746_v47  ;;  %v750_v53 = vpop.f32.mrb[3].mxu0  ;;  %v791_v59 = vpop.f32.mrb[3].mxu1 }
 0x1d4   : > { %vm876_vm2 = vcmp.gt.f32.partialorder %v748_v49, 0.0  ;;  %v884_v55 = vmul.f32 0.01, %v748_v49  ;;  %vm878_vm3 = vcmp.gt.f32.partialorder %v789_v56, 0.0  ;;  %v886_v61 = vmul.f32 0.01, %v789_v56 }
 0x1d5   : > { %v891_v58 = vsel %vm875_vm1, %v746_v47, %v883_v52  ;;  %v4077_v47 = vld [vmem:[%s4984_s13 + $0x30c] ss:$16 sps:$4 sm:$0xff]   ;;  %v4072_v48 = vld [vmem:[%s4984_s13 + $0x300] ss:$16 sps:$4 sm:$0xff]   ;;  %v4080_v50 = vld [vmem:[%s4984_s13 + $0x324] ss:$16 sps:$4 sm:$0xff]  }
 0x1d6   : > { %v892_v60 = vsel %vm876_vm2, %v748_v49, %v884_v55  ;;  %v899_v1 = vpack.c.bf16 %v891_v58, %v891_v58  ;;  %v894_v4 = vsel %vm878_vm3, %v789_v56, %v886_v61  ;;  %v4075_v49 = vld [vmem:[%s4984_s13 + $0x308] ss:$16 sps:$4 sm:$0xff]   ;;  %v4083_v52 = vld [vmem:[%s4984_s13 + $0x32c] ss:$16 sps:$4 sm:$0xff]   ;;  %v4078_v53 = vld [vmem:[%s4984_s13 + $0x320] ss:$16 sps:$4 sm:$0xff]  }
 0x1d7   : > { %v900_v62 = vpack.c.bf16 %v892_v60, %v892_v60  ;;  %v902_v6 = vpack.c.bf16 %v894_v4, %v894_v4  ;;  %v4081_v54 = vld [vmem:[%s4984_s13 + $0x328] ss:$16 sps:$4 sm:$0xff]   ;;  %v4086_v55 = vld [vmem:[%s4984_s13 + $0x344] ss:$16 sps:$4 sm:$0xff]   ;;  %v4089_v56 = vld [vmem:[%s4984_s13 + $0x34c] ss:$16 sps:$4 sm:$0xff]  }
 0x1d8   : > { %v5117_v5 = vpop.f32.mrb[4].mxu0  ;;  %v4084_v57 = vld [vmem:[%s4984_s13 + $0x340] ss:$16 sps:$4 sm:$0xff]   ;;  %v4087_v58 = vld [vmem:[%s4984_s13 + $0x348] ss:$16 sps:$4 sm:$0xff]  }
 0x1d9   : > { %2497 = vmatprep.mubr.bf16.mxu0 %v900_v62  ;;  %2661 = vmatprep.mubr.bf16.mxu1 %v900_v62  ;;  %v5119_v7 = vpop.f32.mrb[5].mxu0  ;;  %v5139_v28 = vpop.f32.mrb[4].mxu1  ;;  %v4092_v59 = vld [vmem:[%s4984_s13 + $0x364] ss:$16 sps:$4 sm:$0xff]   ;;  %v4095_v60 = vld [vmem:[%s4984_s13 + $0x36c] ss:$16 sps:$4 sm:$0xff]  }
 0x1da   : > { %2498 = vmatmul.mubr.bf16.vlgmr.msra.gmra.mrb[8].mxu0 %v899_v1  ;;  %2662 = vmatmul.mubr.bf16.vlgmr.msra.gmra.mrb[8].mxu1 %v899_v1  ;;  %v831_v8 = vpop.f32.mrb[6].mxu0  ;;  %v5143_v31 = vpop.f32.mrb[5].mxu1  ;;  %v4090_v61 = vld [vmem:[%s4984_s13 + $0x360] ss:$16 sps:$4 sm:$0xff]   ;;  %v4093_v62 = vld [vmem:[%s4984_s13 + $0x368] ss:$16 sps:$4 sm:$0xff]  }
 0x1db   : > { %2507 = vmatpush1.bf16.msra.mxu0 %v4024_v63  ;;  %2671 = vmatpush1.bf16.msra.mxu1 %v4027_v0  ;;  %v832_v11 = vpop.f32.mrb[7].mxu0  ;;  %v872_v32 = vpop.f32.mrb[6].mxu1  ;;  %v4098_v63 = vld [vmem:[%s4984_s13 + $0x384] ss:$16 sps:$4 sm:$0xff]   ;;  %v4101_v0 = vld [vmem:[%s4984_s13 + $0x38c] ss:$16 sps:$4 sm:$0xff]  }
 0x1dc   : > { %2508 = vmatprep.subr.bf16.mxu0 %v4032_v2  ;;  %2672 = vmatprep.subr.bf16.mxu1 %v4035_v3  ;;  %v873_v33 = vpop.f32.mrb[7].mxu1  ;;  %v597_v1 = vsub.s32 2, %v5094_v38  ;;  %v609_v2 = vsub.s32 5, %v5094_v38  ;;  %v4096_v3 = vld [vmem:[%s4984_s13 + $0x380] ss:$16 sps:$4 sm:$0xff]  }
 0x1dd   : > { %2538 = vmatprep.mubr.bf16.mxu0 %v902_v6  ;;  %2702 = vmatprep.mubr.bf16.mxu1 %v902_v6  ;;  %v4099_v4 = vld [vmem:[%s4984_s13 + $0x388] ss:$16 sps:$4 sm:$0xff]   ;;  %v4104_v6 = vld [vmem:[%s4984_s13 + $0x3a4] ss:$16 sps:$4 sm:$0xff]   ;;  %v4107_v8 = vld [vmem:[%s4984_s13 + $0x3ac] ss:$16 sps:$4 sm:$0xff]  }
 0x1de   : > { %v4102_v11 = vld [vmem:[%s4984_s13 + $0x3a0] ss:$16 sps:$4 sm:$0xff]   ;;  %v4128_v32 = vld [vmem:[%s4984_s13 + $0x424] ss:$16 sps:$4 sm:$0xff]   ;;  %v4131_v33 = vld [vmem:[%s4984_s13 + $0x42c] ss:$16 sps:$4 sm:$0xff]  }
 0x1df   : > { %2509 = vmatpush1.bf16.msra.mxu0 %v4030_v9  ;;  %2673 = vmatpush1.bf16.msra.mxu1 %v4033_v10  ;;  %v598_v9 = vrot.slane %v5098_v40, %v597_v1  ;;  %v610_v10 = vrot.slane %v5098_v40, %v609_v2  ;;  %v4167_v2 = vld [vmem:[%s4984_s13 + $0x4ec] ss:$16 sps:$4 sm:$0xff]  }
 0x1e0   : > { %2510 = vmatprep.subr.bf16.mxu0 %v4038_v12  ;;  %2674 = vmatprep.subr.bf16.mxu1 %v4041_v13  ;;  %v4105_v12 = vld [vmem:[%s4984_s13 + $0x3a8] ss:$16 sps:$4 sm:$0xff]   ;;  %v4110_v13 = vld [vmem:[%s4984_s13 + $0x3c4] ss:$16 sps:$4 sm:$0xff]  }
 0x1e3   : > { %2511 = vmatpush1.bf16.msra.mxu0 %v4036_v14  ;;  %2675 = vmatpush1.bf16.msra.mxu1 %v4039_v15  ;;  %v4113_v14 = vld [vmem:[%s4984_s13 + $0x3cc] ss:$16 sps:$4 sm:$0xff]   ;;  %v787_v15 = vadd.f32 %v5111_v51, %v598_v9  ;;  %v4114_v51 = vld [vmem:[%s4984_s13 + $0x3e0] ss:$16 sps:$4 sm:$0xff]  }
 0x1e4   : > { %2512 = vmatprep.subr.bf16.mxu0 %v4044_v16  ;;  %2676 = vmatprep.subr.bf16.mxu1 %v4047_v17  ;;  %v830_v16 = vadd.f32 %v5119_v7, %v610_v10  ;;  %v4108_v17 = vld [vmem:[%s4984_s13 + $0x3c0] ss:$16 sps:$4 sm:$0xff]   ;;  %v4117_v7 = vld [vmem:[%s4984_s13 + $0x3e8] ss:$16 sps:$4 sm:$0xff]  }
 0x1e5   : > { %vm877_vm4 = vcmp.gt.f32.partialorder %v787_v15, 0.0  ;;  %v4168_v9 = vld [vmem:[%s4984_s13 + $0x500] ss:$16 sps:$4 sm:$0xff]   ;;  %v4171_v10 = vld [vmem:[%s4984_s13 + $0x508] ss:$16 sps:$4 sm:$0xff]  }
 0x1e6   : > { %vm880_vm5 = vcmp.gt.f32.partialorder %v830_v16, 0.0 }
 0x1e7   : > { %2513 = vmatpush1.bf16.msra.mxu0 %v4042_v18  ;;  %2677 = vmatpush1.bf16.msra.mxu1 %v4045_v19  ;;  %v4111_v18 = vld [vmem:[%s4984_s13 + $0x3c8] ss:$16 sps:$4 sm:$0xff]   ;;  %v4116_v19 = vld [vmem:[%s4984_s13 + $0x3e4] ss:$16 sps:$4 sm:$0xff]  }
 0x1e8   : > { %2514 = vmatprep.subr.bf16.mxu0 %v4050_v20  ;;  %2678 = vmatprep.subr.bf16.mxu1 %v4053_v21  ;;  %v4119_v20 = vld [vmem:[%s4984_s13 + $0x3ec] ss:$16 sps:$4 sm:$0xff]   ;;  %v885_v21 = vmul.f32 0.01, %v787_v15 }
 0x1eb   : > { %2515 = vmatpush1.bf16.msra.mxu0 %v4048_v22  ;;  %2679 = vmatpush1.bf16.msra.mxu1 %v4051_v23  ;;  %v888_v22 = vmul.f32 0.01, %v830_v16  ;;  %v4122_v23 = vld [vmem:[%s4984_s13 + $0x404] ss:$16 sps:$4 sm:$0xff]  }
 0x1ec   : > { %2516 = vmatprep.subr.bf16.mxu0 %v4056_v24  ;;  %2680 = vmatprep.subr.bf16.mxu1 %v4059_v25  ;;  %v4125_v24 = vld [vmem:[%s4984_s13 + $0x40c] ss:$16 sps:$4 sm:$0xff]   ;;  %v893_v25 = vsel %vm877_vm4, %v787_v15, %v885_v21  ;;  %v4182_v15 = vld [vmem:[%s4984_s13 + $0x544] ss:$16 sps:$4 sm:$0xff]   ;;  %v4186_v21 = vld [vmem:[%s4984_s13 + $0x560] ss:$16 sps:$4 sm:$0xff]  }
 0x1ef   : > { %2517 = vmatpush1.bf16.msra.mxu0 %v4054_v26  ;;  %2681 = vmatpush1.bf16.msra.mxu1 %v4057_v27  ;;  %v896_v26 = vsel %vm880_vm5, %v830_v16, %v888_v22  ;;  %v4120_v27 = vld [vmem:[%s4984_s13 + $0x400] ss:$16 sps:$4 sm:$0xff]   ;;  %v4185_v16 = vld [vmem:[%s4984_s13 + $0x54c] ss:$16 sps:$4 sm:$0xff]   ;;  %v4189_v22 = vld [vmem:[%s4984_s13 + $0x568] ss:$16 sps:$4 sm:$0xff]  }
 0x1f0   : > { %2518 = vmatprep.subr.bf16.mxu0 %v4062_v29  ;;  %2682 = vmatprep.subr.bf16.mxu1 %v4065_v30  ;;  %v4123_v29 = vld [vmem:[%s4984_s13 + $0x408] ss:$16 sps:$4 sm:$0xff]   ;;  %v901_v30 = vpack.c.bf16 %v893_v25, %v893_v25  ;;  %v4192_v25 = vld [vmem:[%s4984_s13 + $0x580] ss:$16 sps:$4 sm:$0xff]  }
 0x1f3   : > { %2519 = vmatpush1.bf16.msra.mxu0 %v4060_v34  ;;  %2683 = vmatpush1.bf16.msra.mxu1 %v4063_v35  ;;  %v904_v34 = vpack.c.bf16 %v896_v26, %v896_v26  ;;  %v4126_v35 = vld [vmem:[%s4984_s13 + $0x420] ss:$16 sps:$4 sm:$0xff]   ;;  %v4195_v26 = vld [vmem:[%s4984_s13 + $0x588] ss:$16 sps:$4 sm:$0xff]  }
 0x1f4   : > { %2520 = vmatprep.subr.bf16.mxu0 %v4068_v36  ;;  %2684 = vmatprep.subr.bf16.mxu1 %v4071_v43  ;;  %v4129_v36 = vld [vmem:[%s4984_s13 + $0x428] ss:$16 sps:$4 sm:$0xff]   ;;  %v4134_v43 = vld [vmem:[%s4984_s13 + $0x444] ss:$16 sps:$4 sm:$0xff]  }
 0x1f7   : > { %2521 = vmatpush1.bf16.msra.mxu0 %v4066_v44  ;;  %2685 = vmatpush1.bf16.msra.mxu1 %v4069_v45  ;;  %v4137_v44 = vld [vmem:[%s4984_s13 + $0x44c] ss:$16 sps:$4 sm:$0xff]   ;;  %v4132_v45 = vld [vmem:[%s4984_s13 + $0x440] ss:$16 sps:$4 sm:$0xff]  }
 0x1f8   : > { %2522 = vmatprep.subr.bf16.mxu0 %v4074_v46  ;;  %2686 = vmatprep.subr.bf16.mxu1 %v4077_v47  ;;  %v4135_v46 = vld [vmem:[%s4984_s13 + $0x448] ss:$16 sps:$4 sm:$0xff]   ;;  %v4140_v47 = vld [vmem:[%s4984_s13 + $0x464] ss:$16 sps:$4 sm:$0xff]  }
 0x1fb   : > { %2523 = vmatpush1.bf16.msra.mxu0 %v4072_v48  ;;  %2687 = vmatpush1.bf16.msra.mxu1 %v4075_v49  ;;  %v4143_v48 = vld [vmem:[%s4984_s13 + $0x46c] ss:$16 sps:$4 sm:$0xff]   ;;  %v4138_v49 = vld [vmem:[%s4984_s13 + $0x460] ss:$16 sps:$4 sm:$0xff]  }
 0x1fc   : > { %2524 = vmatprep.subr.bf16.mxu0 %v4080_v50  ;;  %2688 = vmatprep.subr.bf16.mxu1 %v4083_v52  ;;  %v4141_v50 = vld [vmem:[%s4984_s13 + $0x468] ss:$16 sps:$4 sm:$0xff]   ;;  %v4146_v52 = vld [vmem:[%s4984_s13 + $0x484] ss:$16 sps:$4 sm:$0xff]  }
 0x1ff   : > { %2525 = vmatpush1.bf16.msra.mxu0 %v4078_v53  ;;  %2689 = vmatpush1.bf16.msra.mxu1 %v4081_v54  ;;  %v4149_v53 = vld [vmem:[%s4984_s13 + $0x48c] ss:$16 sps:$4 sm:$0xff]   ;;  %v4144_v54 = vld [vmem:[%s4984_s13 + $0x480] ss:$16 sps:$4 sm:$0xff]  }
 0x200   : > { %2526 = vmatprep.subr.bf16.mxu0 %v4086_v55  ;;  %2690 = vmatprep.subr.bf16.mxu1 %v4089_v56  ;;  %v4147_v55 = vld [vmem:[%s4984_s13 + $0x488] ss:$16 sps:$4 sm:$0xff]   ;;  %v4152_v56 = vld [vmem:[%s4984_s13 + $0x4a4] ss:$16 sps:$4 sm:$0xff]  }
 0x203   : > { %2527 = vmatpush1.bf16.msra.mxu0 %v4084_v57  ;;  %2691 = vmatpush1.bf16.msra.mxu1 %v4087_v58  ;;  %v4155_v57 = vld [vmem:[%s4984_s13 + $0x4ac] ss:$16 sps:$4 sm:$0xff]   ;;  %v4150_v58 = vld [vmem:[%s4984_s13 + $0x4a0] ss:$16 sps:$4 sm:$0xff]  }
 0x204   : > { %2528 = vmatprep.subr.bf16.mxu0 %v4092_v59  ;;  %2692 = vmatprep.subr.bf16.mxu1 %v4095_v60  ;;  %v4153_v59 = vld [vmem:[%s4984_s13 + $0x4a8] ss:$16 sps:$4 sm:$0xff]   ;;  %v4158_v60 = vld [vmem:[%s4984_s13 + $0x4c4] ss:$16 sps:$4 sm:$0xff]  }
 0x207   : > { %2529 = vmatpush1.bf16.msra.mxu0 %v4090_v61  ;;  %2693 = vmatpush1.bf16.msra.mxu1 %v4093_v62  ;;  %v4161_v61 = vld [vmem:[%s4984_s13 + $0x4cc] ss:$16 sps:$4 sm:$0xff]   ;;  %v4156_v62 = vld [vmem:[%s4984_s13 + $0x4c0] ss:$16 sps:$4 sm:$0xff]  }
 0x208   : > { %2530 = vmatprep.subr.bf16.mxu0 %v4098_v63  ;;  %2694 = vmatprep.subr.bf16.mxu1 %v4101_v0  ;;  %v4159_v63 = vld [vmem:[%s4984_s13 + $0x4c8] ss:$16 sps:$4 sm:$0xff]   ;;  %v4164_v0 = vld [vmem:[%s4984_s13 + $0x4e4] ss:$16 sps:$4 sm:$0xff]  }
 0x20b   : > { %2531 = vmatpush1.bf16.msra.mxu0 %v4096_v3  ;;  %2695 = vmatpush1.bf16.msra.mxu1 %v4099_v4  ;;  %v4162_v3 = vld [vmem:[%s4984_s13 + $0x4e0] ss:$16 sps:$4 sm:$0xff]   ;;  %v4165_v4 = vld [vmem:[%s4984_s13 + $0x4e8] ss:$16 sps:$4 sm:$0xff]  }
 0x20c   : > { %2532 = vmatprep.subr.bf16.mxu0 %v4104_v6  ;;  %2696 = vmatprep.subr.bf16.mxu1 %v4107_v8  ;;  %v4170_v6 = vld [vmem:[%s4984_s13 + $0x504] ss:$16 sps:$4 sm:$0xff]   ;;  %v4173_v8 = vld [vmem:[%s4984_s13 + $0x50c] ss:$16 sps:$4 sm:$0xff]  }
 0x20f   : > { %2533 = vmatpush1.bf16.msra.mxu0 %v4102_v11  ;;  %2697 = vmatpush1.bf16.msra.mxu1 %v4105_v12  ;;  %v4176_v11 = vld [vmem:[%s4984_s13 + $0x524] ss:$16 sps:$4 sm:$0xff]   ;;  %v4179_v12 = vld [vmem:[%s4984_s13 + $0x52c] ss:$16 sps:$4 sm:$0xff]  }
 0x210   : > { %2534 = vmatprep.subr.bf16.mxu0 %v4110_v13  ;;  %2698 = vmatprep.subr.bf16.mxu1 %v4113_v14  ;;  %v4174_v13 = vld [vmem:[%s4984_s13 + $0x520] ss:$16 sps:$4 sm:$0xff]   ;;  %v4177_v14 = vld [vmem:[%s4984_s13 + $0x528] ss:$16 sps:$4 sm:$0xff]  }
 0x213   : > { %2535 = vmatpush1.bf16.msra.mxu0 %v4108_v17  ;;  %2699 = vmatpush1.bf16.msra.mxu1 %v4111_v18  ;;  %v4180_v17 = vld [vmem:[%s4984_s13 + $0x540] ss:$16 sps:$4 sm:$0xff]   ;;  %v4183_v18 = vld [vmem:[%s4984_s13 + $0x548] ss:$16 sps:$4 sm:$0xff]  }
 0x214   : > { %2536 = vmatprep.subr.bf16.mxu0 %v4116_v19  ;;  %2700 = vmatprep.subr.bf16.mxu1 %v4119_v20  ;;  %v4188_v19 = vld [vmem:[%s4984_s13 + $0x564] ss:$16 sps:$4 sm:$0xff]   ;;  %v4191_v20 = vld [vmem:[%s4984_s13 + $0x56c] ss:$16 sps:$4 sm:$0xff]  }
 0x217   : > { %2537 = vmatpush1.bf16.msra.mxu0 %v4114_v51  ;;  %2701 = vmatpush1.bf16.msra.mxu1 %v4117_v7  ;;  %v4194_v51 = vld [vmem:[%s4984_s13 + $0x584] ss:$16 sps:$4 sm:$0xff]   ;;  %v4197_v7 = vld [vmem:[%s4984_s13 + $0x58c] ss:$16 sps:$4 sm:$0xff]  }
 0x218   : > { %2547 = vmatprep.subr.bf16.mxu0 %v4122_v23  ;;  %2711 = vmatprep.subr.bf16.mxu1 %v4125_v24  ;;  %v605_v23 = vsub.s32 4, %v5094_v38  ;;  %v617_v24 = vsub.s32 7, %v5094_v38 }
 0x21a   : > { %2539 = vmatmul.mubr.bf16.vlgmr.msra.gmra.mrb[8].mxu0 %v901_v30  ;;  %2703 = vmatmul.mubr.bf16.vlgmr.msra.gmra.mrb[8].mxu1 %v901_v30  ;;  %v606_v30 = vrot.slane %v5098_v40, %v605_v23  ;;  %v4258_v23 = vld [vmem:[%s4984_s13 + $0x6e0] ss:$16 sps:$4 sm:$0xff]  }
 0x21b   : > { %2548 = vmatpush1.bf16.msra.mxu0 %v4120_v27  ;;  %2712 = vmatpush1.bf16.msra.mxu1 %v4123_v29  ;;  %v4200_v27 = vld [vmem:[%s4984_s13 + $0x5a4] ss:$16 sps:$4 sm:$0xff]   ;;  %v4203_v29 = vld [vmem:[%s4984_s13 + $0x5ac] ss:$16 sps:$4 sm:$0xff]  }
 0x21c   : > { %2549 = vmatprep.subr.bf16.mxu0 %v4128_v32  ;;  %2713 = vmatprep.subr.bf16.mxu1 %v4131_v33  ;;  %v618_v32 = vrot.slane %v5098_v40, %v617_v24  ;;  %v4198_v33 = vld [vmem:[%s4984_s13 + $0x5a0] ss:$16 sps:$4 sm:$0xff]   ;;  %v4261_v24 = vld [vmem:[%s4984_s13 + $0x6e8] ss:$16 sps:$4 sm:$0xff]  }
 0x21d   : > { %2579 = vmatprep.mubr.bf16.mxu0 %v904_v34  ;;  %2743 = vmatprep.mubr.bf16.mxu1 %v904_v34  ;;  %v4201_v34 = vld [vmem:[%s4984_s13 + $0x5a8] ss:$16 sps:$4 sm:$0xff]  }
 0x21f   : > { %2550 = vmatpush1.bf16.msra.mxu0 %v4126_v35  ;;  %2714 = vmatpush1.bf16.msra.mxu1 %v4129_v36  ;;  %v4206_v35 = vld [vmem:[%s4984_s13 + $0x5c4] ss:$16 sps:$4 sm:$0xff]   ;;  %v4209_v36 = vld [vmem:[%s4984_s13 + $0x5cc] ss:$16 sps:$4 sm:$0xff]  }
 0x220   : > { %2551 = vmatprep.subr.bf16.mxu0 %v4134_v43  ;;  %2715 = vmatprep.subr.bf16.mxu1 %v4137_v44  ;;  %v828_v43 = vadd.f32 %v5117_v5, %v606_v30  ;;  %v871_v44 = vadd.f32 %v5143_v31, %v618_v32  ;;  %v4210_v5 = vld [vmem:[%s4984_s13 + $0x5e0] ss:$16 sps:$4 sm:$0xff]   ;;  %v4213_v31 = vld [vmem:[%s4984_s13 + $0x5e8] ss:$16 sps:$4 sm:$0xff]   ;;  %v4272_v30 = vld [vmem:[%s4984_s13 + $0x724] ss:$16 sps:$4 sm:$0xff]  }
 0x221   : > { %v4275_v32 = vld [vmem:[%s4984_s13 + $0x72c] ss:$16 sps:$4 sm:$0xff]  }
 0x222   : > { %vm879_vm6 = vcmp.gt.f32.partialorder %v828_v43, 0.0  ;;  %vm882_vm7 = vcmp.gt.f32.partialorder %v871_v44, 0.0 }
 0x223   : > { %2552 = vmatpush1.bf16.msra.mxu0 %v4132_v45  ;;  %2716 = vmatpush1.bf16.msra.mxu1 %v4135_v46  ;;  %v4204_v45 = vld [vmem:[%s4984_s13 + $0x5c0] ss:$16 sps:$4 sm:$0xff]   ;;  %v4207_v46 = vld [vmem:[%s4984_s13 + $0x5c8] ss:$16 sps:$4 sm:$0xff]  }
 0x224   : > { %2553 = vmatprep.subr.bf16.mxu0 %v4140_v47  ;;  %2717 = vmatprep.subr.bf16.mxu1 %v4143_v48  ;;  %v4212_v47 = vld [vmem:[%s4984_s13 + $0x5e4] ss:$16 sps:$4 sm:$0xff]   ;;  %v4215_v48 = vld [vmem:[%s4984_s13 + $0x5ec] ss:$16 sps:$4 sm:$0xff]  }
 0x227   : > { %2554 = vmatpush1.bf16.msra.mxu0 %v4138_v49  ;;  %2718 = vmatpush1.bf16.msra.mxu1 %v4141_v50  ;;  %v887_v49 = vmul.f32 0.01, %v828_v43  ;;  %v890_v50 = vmul.f32 0.01, %v871_v44 }
 0x228   : > { %2555 = vmatprep.subr.bf16.mxu0 %v4146_v52  ;;  %2719 = vmatprep.subr.bf16.mxu1 %v4149_v53  ;;  %v4218_v52 = vld [vmem:[%s4984_s13 + $0x604] ss:$16 sps:$4 sm:$0xff]   ;;  %v4221_v53 = vld [vmem:[%s4984_s13 + $0x60c] ss:$16 sps:$4 sm:$0xff]  }
 0x22b   : > { %2556 = vmatpush1.bf16.msra.mxu0 %v4144_v54  ;;  %2720 = vmatpush1.bf16.msra.mxu1 %v4147_v55  ;;  %v895_v54 = vsel %vm879_vm6, %v828_v43, %v887_v49  ;;  %v898_v55 = vsel %vm882_vm7, %v871_v44, %v890_v50  ;;  %v4276_v43 = vld [vmem:[%s4984_s13 + $0x740] ss:$16 sps:$4 sm:$0xff]   ;;  %v4279_v44 = vld [vmem:[%s4984_s13 + $0x748] ss:$16 sps:$4 sm:$0xff]   ;;  %v4290_v49 = vld [vmem:[%s4984_s13 + $0x784] ss:$16 sps:$4 sm:$0xff]  }
 0x22c   : > { %2557 = vmatprep.subr.bf16.mxu0 %v4152_v56  ;;  %2721 = vmatprep.subr.bf16.mxu1 %v4155_v57  ;;  %v4216_v56 = vld [vmem:[%s4984_s13 + $0x600] ss:$16 sps:$4 sm:$0xff]   ;;  %v4219_v57 = vld [vmem:[%s4984_s13 + $0x608] ss:$16 sps:$4 sm:$0xff]   ;;  %v4293_v50 = vld [vmem:[%s4984_s13 + $0x78c] ss:$16 sps:$4 sm:$0xff]  }
 0x22f   : > { %2558 = vmatpush1.bf16.msra.mxu0 %v4150_v58  ;;  %2722 = vmatpush1.bf16.msra.mxu1 %v4153_v59  ;;  %v903_v58 = vpack.c.bf16 %v895_v54, %v895_v54  ;;  %v4224_v59 = vld [vmem:[%s4984_s13 + $0x624] ss:$16 sps:$4 sm:$0xff]   ;;  %v4299_v54 = vld [vmem:[%s4984_s13 + $0x7ac] ss:$16 sps:$4 sm:$0xff]  }
 0x230   : > { %2559 = vmatprep.subr.bf16.mxu0 %v4158_v60  ;;  %2723 = vmatprep.subr.bf16.mxu1 %v4161_v61  ;;  %v4227_v60 = vld [vmem:[%s4984_s13 + $0x62c] ss:$16 sps:$4 sm:$0xff]   ;;  %v906_v61 = vpack.c.bf16 %v898_v55, %v898_v55 }
 0x233   : > { %2560 = vmatpush1.bf16.msra.mxu0 %v4156_v62  ;;  %2724 = vmatpush1.bf16.msra.mxu1 %v4159_v63  ;;  %v4222_v62 = vld [vmem:[%s4984_s13 + $0x620] ss:$16 sps:$4 sm:$0xff]   ;;  %v4225_v63 = vld [vmem:[%s4984_s13 + $0x628] ss:$16 sps:$4 sm:$0xff]  }
 0x234   : > { %2561 = vmatprep.subr.bf16.mxu0 %v4164_v0  ;;  %2725 = vmatprep.subr.bf16.mxu1 %v4167_v2  ;;  %v4230_v0 = vld [vmem:[%s4984_s13 + $0x644] ss:$16 sps:$4 sm:$0xff]   ;;  %v4233_v2 = vld [vmem:[%s4984_s13 + $0x64c] ss:$16 sps:$4 sm:$0xff]  }
 0x237   : > { %2562 = vmatpush1.bf16.msra.mxu0 %v4162_v3  ;;  %2726 = vmatpush1.bf16.msra.mxu1 %v4165_v4  ;;  %v4228_v3 = vld [vmem:[%s4984_s13 + $0x640] ss:$16 sps:$4 sm:$0xff]   ;;  %v4231_v4 = vld [vmem:[%s4984_s13 + $0x648] ss:$16 sps:$4 sm:$0xff]  }
 0x238   : > { %2563 = vmatprep.subr.bf16.mxu0 %v4170_v6  ;;  %2727 = vmatprep.subr.bf16.mxu1 %v4173_v8  ;;  %v4236_v6 = vld [vmem:[%s4984_s13 + $0x664] ss:$16 sps:$4 sm:$0xff]   ;;  %v4239_v8 = vld [vmem:[%s4984_s13 + $0x66c] ss:$16 sps:$4 sm:$0xff]  }
 0x23b   : > { %2564 = vmatpush1.bf16.msra.mxu0 %v4168_v9  ;;  %2728 = vmatpush1.bf16.msra.mxu1 %v4171_v10  ;;  %v4234_v9 = vld [vmem:[%s4984_s13 + $0x660] ss:$16 sps:$4 sm:$0xff]   ;;  %v4237_v10 = vld [vmem:[%s4984_s13 + $0x668] ss:$16 sps:$4 sm:$0xff]  }
 0x23c   : > { %2565 = vmatprep.subr.bf16.mxu0 %v4176_v11  ;;  %2729 = vmatprep.subr.bf16.mxu1 %v4179_v12  ;;  %v4242_v11 = vld [vmem:[%s4984_s13 + $0x684] ss:$16 sps:$4 sm:$0xff]   ;;  %v4245_v12 = vld [vmem:[%s4984_s13 + $0x68c] ss:$16 sps:$4 sm:$0xff]  }
 0x23f   : > { %2566 = vmatpush1.bf16.msra.mxu0 %v4174_v13  ;;  %2730 = vmatpush1.bf16.msra.mxu1 %v4177_v14  ;;  %v4240_v13 = vld [vmem:[%s4984_s13 + $0x680] ss:$16 sps:$4 sm:$0xff]   ;;  %v4243_v14 = vld [vmem:[%s4984_s13 + $0x688] ss:$16 sps:$4 sm:$0xff]  }
 0x240   : > { %2567 = vmatprep.subr.bf16.mxu0 %v4182_v15  ;;  %2731 = vmatprep.subr.bf16.mxu1 %v4185_v16  ;;  %v4248_v15 = vld [vmem:[%s4984_s13 + $0x6a4] ss:$16 sps:$4 sm:$0xff]   ;;  %v4251_v16 = vld [vmem:[%s4984_s13 + $0x6ac] ss:$16 sps:$4 sm:$0xff]  }
 0x243   : > { %2568 = vmatpush1.bf16.msra.mxu0 %v4180_v17  ;;  %2732 = vmatpush1.bf16.msra.mxu1 %v4183_v18  ;;  %v4246_v17 = vld [vmem:[%s4984_s13 + $0x6a0] ss:$16 sps:$4 sm:$0xff]   ;;  %v4249_v18 = vld [vmem:[%s4984_s13 + $0x6a8] ss:$16 sps:$4 sm:$0xff]  }
 0x244   : > { %2569 = vmatprep.subr.bf16.mxu0 %v4188_v19  ;;  %2733 = vmatprep.subr.bf16.mxu1 %v4191_v20  ;;  %v4254_v19 = vld [vmem:[%s4984_s13 + $0x6c4] ss:$16 sps:$4 sm:$0xff]   ;;  %v4257_v20 = vld [vmem:[%s4984_s13 + $0x6cc] ss:$16 sps:$4 sm:$0xff]  }
 0x247   : > { %2570 = vmatpush1.bf16.msra.mxu0 %v4186_v21  ;;  %2734 = vmatpush1.bf16.msra.mxu1 %v4189_v22  ;;  %v4252_v21 = vld [vmem:[%s4984_s13 + $0x6c0] ss:$16 sps:$4 sm:$0xff]   ;;  %v4255_v22 = vld [vmem:[%s4984_s13 + $0x6c8] ss:$16 sps:$4 sm:$0xff]  }
 0x248   : > { %2571 = vmatprep.subr.bf16.mxu0 %v4194_v51  ;;  %2735 = vmatprep.subr.bf16.mxu1 %v4197_v7  ;;  %v4260_v51 = vld [vmem:[%s4984_s13 + $0x6e4] ss:$16 sps:$4 sm:$0xff]   ;;  %v4263_v7 = vld [vmem:[%s4984_s13 + $0x6ec] ss:$16 sps:$4 sm:$0xff]  }
 0x24b   : > { %2572 = vmatpush1.bf16.msra.mxu0 %v4192_v25  ;;  %2736 = vmatpush1.bf16.msra.mxu1 %v4195_v26  ;;  %v4266_v25 = vld [vmem:[%s4984_s13 + $0x704] ss:$16 sps:$4 sm:$0xff]   ;;  %v4269_v26 = vld [vmem:[%s4984_s13 + $0x70c] ss:$16 sps:$4 sm:$0xff]  }
 0x24c   : > { %2573 = vmatprep.subr.bf16.mxu0 %v4200_v27  ;;  %2737 = vmatprep.subr.bf16.mxu1 %v4203_v29  ;;  %v4264_v27 = vld [vmem:[%s4984_s13 + $0x700] ss:$16 sps:$4 sm:$0xff]   ;;  %v4267_v29 = vld [vmem:[%s4984_s13 + $0x708] ss:$16 sps:$4 sm:$0xff]  }
 0x24f   : > { %2574 = vmatpush1.bf16.msra.mxu0 %v4198_v33  ;;  %2738 = vmatpush1.bf16.msra.mxu1 %v4201_v34  ;;  %v4270_v33 = vld [vmem:[%s4984_s13 + $0x720] ss:$16 sps:$4 sm:$0xff]   ;;  %v4273_v34 = vld [vmem:[%s4984_s13 + $0x728] ss:$16 sps:$4 sm:$0xff]  }
 0x250   : > { %2575 = vmatprep.subr.bf16.mxu0 %v4206_v35  ;;  %2739 = vmatprep.subr.bf16.mxu1 %v4209_v36  ;;  %v4278_v35 = vld [vmem:[%s4984_s13 + $0x744] ss:$16 sps:$4 sm:$0xff]   ;;  %v4281_v36 = vld [vmem:[%s4984_s13 + $0x74c] ss:$16 sps:$4 sm:$0xff]  }
 0x253   : > { %2576 = vmatpush1.bf16.msra.mxu0 %v4204_v45  ;;  %2740 = vmatpush1.bf16.msra.mxu1 %v4207_v46  ;;  %v4284_v45 = vld [vmem:[%s4984_s13 + $0x764] ss:$16 sps:$4 sm:$0xff]   ;;  %v4287_v46 = vld [vmem:[%s4984_s13 + $0x76c] ss:$16 sps:$4 sm:$0xff]  }
 0x254   : > { %2577 = vmatprep.subr.bf16.mxu0 %v4212_v47  ;;  %2741 = vmatprep.subr.bf16.mxu1 %v4215_v48  ;;  %v4282_v47 = vld [vmem:[%s4984_s13 + $0x760] ss:$16 sps:$4 sm:$0xff]   ;;  %v4285_v48 = vld [vmem:[%s4984_s13 + $0x768] ss:$16 sps:$4 sm:$0xff]  }
 0x257   : > { %2578 = vmatpush1.bf16.msra.mxu0 %v4210_v5  ;;  %2742 = vmatpush1.bf16.msra.mxu1 %v4213_v31  ;;  %v613_v5 = vsub.s32 6, %v5094_v38  ;;  %v4288_v31 = vld [vmem:[%s4984_s13 + $0x780] ss:$16 sps:$4 sm:$0xff]  }
 0x258   : > { %2588 = vmatprep.subr.bf16.mxu0 %v4218_v52  ;;  %2752 = vmatprep.subr.bf16.mxu1 %v4221_v53  ;;  %v4291_v52 = vld [vmem:[%s4984_s13 + $0x788] ss:$16 sps:$4 sm:$0xff]   ;;  %v4296_v53 = vld [vmem:[%s4984_s13 + $0x7a4] ss:$16 sps:$4 sm:$0xff]  }
 0x259   : > { %v614_v55 = vrot.slane %v5098_v40, %v613_v5  ;;  %v4303_v40 = vld [vmem:[%s4984_s13 + $0x7c8] ss:$16 sps:$4 sm:$0xff]  }
 0x25a   : > { %2580 = vmatmul.mubr.bf16.vlgmr.msra.gmra.mrb[8].mxu0 %v903_v58  ;;  %2744 = vmatmul.mubr.bf16.vlgmr.msra.gmra.mrb[8].mxu1 %v903_v58  ;;  %v4302_v58 = vld [vmem:[%s4984_s13 + $0x7c4] ss:$16 sps:$4 sm:$0xff]  }
 0x25b   : > { %2589 = vmatpush1.bf16.msra.mxu0 %v4216_v56  ;;  %2753 = vmatpush1.bf16.msra.mxu1 %v4219_v57  ;;  %v4294_v56 = vld [vmem:[%s4984_s13 + $0x7a0] ss:$16 sps:$4 sm:$0xff]   ;;  %v4297_v57 = vld [vmem:[%s4984_s13 + $0x7a8] ss:$16 sps:$4 sm:$0xff]  }
 0x25c   : > { %2590 = vmatprep.subr.bf16.mxu0 %v4224_v59  ;;  %2754 = vmatprep.subr.bf16.mxu1 %v4227_v60  ;;  %v4305_v59 = vld [vmem:[%s4984_s13 + $0x7cc] ss:$16 sps:$4 sm:$0xff]   ;;  %v869_v60 = vadd.f32 %v5139_v28, %v614_v55  ;;  %v4309_v28 = vld [vmem:[%s4984_s13 + $0x7e8] ss:$16 sps:$4 sm:$0xff]  }
 0x25d   : > { %2620 = vmatprep.mubr.bf16.mxu0 %v906_v61  ;;  %2784 = vmatprep.mubr.bf16.mxu1 %v906_v61  ;;  %v4300_v61 = vld [vmem:[%s4984_s13 + $0x7c0] ss:$16 sps:$4 sm:$0xff]  }
 0x25e   : > { %vm881_vm8 = vcmp.gt.f32.partialorder %v869_v60, 0.0 }
 0x25f   : > { %2591 = vmatpush1.bf16.msra.mxu0 %v4222_v62  ;;  %2755 = vmatpush1.bf16.msra.mxu1 %v4225_v63  ;;  %v4308_v62 = vld [vmem:[%s4984_s13 + $0x7e4] ss:$16 sps:$4 sm:$0xff]   ;;  %v4311_v63 = vld [vmem:[%s4984_s13 + $0x7ec] ss:$16 sps:$4 sm:$0xff]  }
 0x260   : > { %2592 = vmatprep.subr.bf16.mxu0 %v4230_v0  ;;  %2756 = vmatprep.subr.bf16.mxu1 %v4233_v2  ;;  %v889_v0 = vmul.f32 0.01, %v869_v60  ;;  %v4306_v2 = vld [vmem:[%s4984_s13 + $0x7e0] ss:$16 sps:$4 sm:$0xff]  }
 0x263   : > { %2593 = vmatpush1.bf16.msra.mxu0 %v4228_v3  ;;  %2757 = vmatpush1.bf16.msra.mxu1 %v4231_v4  ;;  %v4312_v3 = vld [vmem:[%s4994_s6 + $0x40] sm:$0xff]  }
 0x264   : > { %2594 = vmatprep.subr.bf16.mxu0 %v4236_v6  ;;  %2758 = vmatprep.subr.bf16.mxu1 %v4239_v8  ;;  %v4313_v4 = vld [vmem:[%s4994_s6 + $0xc0] sm:$0xff]   ;;  %v897_v6 = vsel %vm881_vm8, %v869_v60, %v889_v0 }
 0x265   : > { %v4314_v8 = vld [vmem:[%s4994_s6] sm:$0xff]  }
 0x267   : > { %2595 = vmatpush1.bf16.msra.mxu0 %v4234_v9  ;;  %2759 = vmatpush1.bf16.msra.mxu1 %v4237_v10  ;;  %v4315_v9 = vld [vmem:[%s4994_s6 + $0x80] sm:$0xff]   ;;  %v905_v10 = vpack.c.bf16 %v897_v6, %v897_v6 }
 0x268   : > { %2596 = vmatprep.subr.bf16.mxu0 %v4242_v11  ;;  %2760 = vmatprep.subr.bf16.mxu1 %v4245_v12  ;;  %v4316_v11 = vld [vmem:[%s4994_s6 + $0x48] sm:$0xff]   ;;  %v3714_v6 = vld [vmem:[%s488_s17] ss:$0 sm:$0xff] }
 0x269   : > { %v4317_v12 = vld [vmem:[%s4994_s6 + $0xc8] sm:$0xff]  }
 0x26b   : > { %2597 = vmatpush1.bf16.msra.mxu0 %v4240_v13  ;;  %2761 = vmatpush1.bf16.msra.mxu1 %v4243_v14  ;;  %v4318_v13 = vld [vmem:[%s4994_s6 + $0x8] sm:$0xff]  }
 0x26c   : > { %2598 = vmatprep.subr.bf16.mxu0 %v4248_v15  ;;  %2762 = vmatprep.subr.bf16.mxu1 %v4251_v16  ;;  %v4319_v14 = vld [vmem:[%s4994_s6 + $0x88] sm:$0xff]   ;;  %v4320_v15 = vld [vmem:[%s4994_s6 + $0x50] sm:$0xff]  }
 0x26d   : > { %v4321_v16 = vld [vmem:[%s4994_s6 + $0xd0] sm:$0xff]  }
 0x26f   : > { %2599 = vmatpush1.bf16.msra.mxu0 %v4246_v17  ;;  %2763 = vmatpush1.bf16.msra.mxu1 %v4249_v18  ;;  %v4322_v17 = vld [vmem:[%s4994_s6 + $0x10] sm:$0xff]  }
 0x270   : > { %2600 = vmatprep.subr.bf16.mxu0 %v4254_v19  ;;  %2764 = vmatprep.subr.bf16.mxu1 %v4257_v20  ;;  %v4323_v18 = vld [vmem:[%s4994_s6 + $0x90] sm:$0xff]   ;;  %v4324_v19 = vld [vmem:[%s4994_s6 + $0x58] sm:$0xff]  }
 0x271   : > { %v4325_v20 = vld [vmem:[%s4994_s6 + $0xd8] sm:$0xff]  }
 0x273   : > { %2601 = vmatpush1.bf16.msra.mxu0 %v4252_v21  ;;  %2765 = vmatpush1.bf16.msra.mxu1 %v4255_v22  ;;  %v4326_v21 = vld [vmem:[%s4994_s6 + $0x18] sm:$0xff]  }
 0x274   : > { %2602 = vmatprep.subr.bf16.mxu0 %v4260_v51  ;;  %2766 = vmatprep.subr.bf16.mxu1 %v4263_v7  ;;  %v4327_v22 = vld [vmem:[%s4994_s6 + $0x98] sm:$0xff]   ;;  %v4328_v51 = vld [vmem:[%s4994_s6 + $0x60] sm:$0xff]  }
 0x275   : > { %v4329_v7 = vld [vmem:[%s4994_s6 + $0xe0] sm:$0xff]  }
 0x277   : > { %2603 = vmatpush1.bf16.msra.mxu0 %v4258_v23  ;;  %2767 = vmatpush1.bf16.msra.mxu1 %v4261_v24  ;;  %v4330_v23 = vld [vmem:[%s4994_s6 + $0x20] sm:$0xff]  }
 0x278   : > { %2604 = vmatprep.subr.bf16.mxu0 %v4266_v25  ;;  %2768 = vmatprep.subr.bf16.mxu1 %v4269_v26  ;;  %v4331_v24 = vld [vmem:[%s4994_s6 + $0xa0] sm:$0xff]   ;;  %v4332_v25 = vld [vmem:[%s4994_s6 + $0x68] sm:$0xff]  }
 0x279   : > { %v4333_v26 = vld [vmem:[%s4994_s6 + $0xe8] sm:$0xff]  }
 0x27b   : > { %2605 = vmatpush1.bf16.msra.mxu0 %v4264_v27  ;;  %2769 = vmatpush1.bf16.msra.mxu1 %v4267_v29  ;;  %v4334_v27 = vld [vmem:[%s4994_s6 + $0x28] sm:$0xff]  }
 0x27c   : > { %2606 = vmatprep.subr.bf16.mxu0 %v4272_v30  ;;  %2770 = vmatprep.subr.bf16.mxu1 %v4275_v32  ;;  %v4335_v29 = vld [vmem:[%s4994_s6 + $0xa8] sm:$0xff]   ;;  %v4336_v30 = vld [vmem:[%s4994_s6 + $0x70] sm:$0xff]  }
 0x27d   : > { %v4337_v32 = vld [vmem:[%s4994_s6 + $0xf0] sm:$0xff]  }
 0x27f   : > { %2607 = vmatpush1.bf16.msra.mxu0 %v4270_v33  ;;  %2771 = vmatpush1.bf16.msra.mxu1 %v4273_v34  ;;  %v4338_v33 = vld [vmem:[%s4994_s6 + $0x30] sm:$0xff]  }
 0x280   : > { %2608 = vmatprep.subr.bf16.mxu0 %v4278_v35  ;;  %2772 = vmatprep.subr.bf16.mxu1 %v4281_v36  ;;  %v4339_v34 = vld [vmem:[%s4994_s6 + $0xb0] sm:$0xff]   ;;  %v4340_v35 = vld [vmem:[%s4994_s6 + $0x78] sm:$0xff]  }
 0x281   : > { %v4341_v36 = vld [vmem:[%s4994_s6 + $0xf8] sm:$0xff]  }
 0x283   : > { %2609 = vmatpush1.bf16.msra.mxu0 %v4276_v43  ;;  %2773 = vmatpush1.bf16.msra.mxu1 %v4279_v44  ;;  %v4342_v43 = vld [vmem:[%s4994_s6 + $0x38] sm:$0xff]  }
 0x284   : > { %2610 = vmatprep.subr.bf16.mxu0 %v4284_v45  ;;  %2774 = vmatprep.subr.bf16.mxu1 %v4287_v46  ;;  %v4343_v44 = vld [vmem:[%s4994_s6 + $0xb8] sm:$0xff]  }
 0x285   : > { %v1163_v45 = vld [vmem:[%s4992_s16] sm:$0xf] }
 0x286   : > { %v1168_v46 = vrot.slane %v1163_v45, %v589_v39 }
 0x287   : > { %2611 = vmatpush1.bf16.msra.mxu0 %v4282_v47  ;;  %2775 = vmatpush1.bf16.msra.mxu1 %v4285_v48  ;;  %v1176_v47 = vrot.slane %v1163_v45, %v597_v1  ;;  %v1172_v48 = vrot.slane %v1163_v45, %v593_v41 }
 0x288   : > { %2612 = vmatprep.subr.bf16.mxu0 %v4290_v49  ;;  %2776 = vmatprep.subr.bf16.mxu1 %v4293_v50  ;;  %v1180_v49 = vrot.slane %v1163_v45, %v601_v42 }
 0x28b   : > { %2613 = vmatpush1.bf16.msra.mxu0 %v4288_v31  ;;  %2777 = vmatpush1.bf16.msra.mxu1 %v4291_v52 }
 0x28c   : > { %2614 = vmatprep.subr.bf16.mxu0 %v4296_v53  ;;  %2778 = vmatprep.subr.bf16.mxu1 %v4299_v54 }
 0x28f   : > { %2615 = vmatpush1.bf16.msra.mxu0 %v4294_v56  ;;  %2779 = vmatpush1.bf16.msra.mxu1 %v4297_v57 }
 0x290   : > { %2616 = vmatprep.subr.bf16.mxu0 %v4302_v58  ;;  %2780 = vmatprep.subr.bf16.mxu1 %v4305_v59 }
 0x293   : > { %2617 = vmatpush1.bf16.msra.mxu0 %v4300_v61  ;;  %2781 = vmatpush1.bf16.msra.mxu1 %v4303_v40 }
 0x294   : > { %2618 = vmatprep.subr.bf16.mxu0 %v4308_v62  ;;  %2782 = vmatprep.subr.bf16.mxu1 %v4311_v63 }
 0x297   : > { %2619 = vmatpush1.bf16.msra.mxu0 %v4306_v2  ;;  %2783 = vmatpush1.bf16.msra.mxu1 %v4309_v28 }
 0x298   : > { %3757 = vmatprep.subr.bf16.mxu0 %v4312_v3  ;;  %3779 = vmatprep.subr.bf16.mxu1 %v4313_v4 }
 0x29a   : > { %2621 = vmatmul.mubr.bf16.vlgmr.msra.gmra.mrb[8].mxu0 %v905_v10  ;;  %2785 = vmatmul.mubr.bf16.vlgmr.msra.gmra.mrb[8].mxu1 %v905_v10 }
 0x29b   : > { %3758 = vmatpush3.bf16.msra.mxu0 %v4314_v8  ;;  %3780 = vmatpush3.bf16.msra.mxu1 %v4315_v9 }
 0x29c   : > { %3759 = vmatprep.subr.bf16.mxu0 %v4316_v11  ;;  %3781 = vmatprep.subr.bf16.mxu1 %v4317_v12 }
 0x29f   : > { %3760 = vmatpush3.bf16.msra.mxu0 %v4318_v13  ;;  %3782 = vmatpush3.bf16.msra.mxu1 %v4319_v14 }
 0x2a0   : > { %3761 = vmatprep.subr.bf16.mxu0 %v4320_v15  ;;  %3783 = vmatprep.subr.bf16.mxu1 %v4321_v16 }
 0x2a3   : > { %3762 = vmatpush3.bf16.msra.mxu0 %v4322_v17  ;;  %3784 = vmatpush3.bf16.msra.mxu1 %v4323_v18  ;;  %v3157_v18 = vand.u32 (!%p3747_p0), 127, %v587_v37 }
 0x2a4   : > { %3763 = vmatprep.subr.bf16.mxu0 %v4324_v19  ;;  %3785 = vmatprep.subr.bf16.mxu1 %v4325_v20  ;;  %v3159_v19 = vld [vmem:[%s5448_s18] sm:$0xff] (!%p3747_p0) }
 0x2a5   : > { %vm3158_vm13 = vcmp.lt.s32.totalorder (!%p3747_p0), %v3157_v18, 16 }
 0x2a7   : > { %3764 = vmatpush3.bf16.msra.mxu0 %v4326_v21  ;;  %3786 = vmatpush3.bf16.msra.mxu1 %v4327_v22 }
 0x2a8   : > { %3765 = vmatprep.subr.bf16.mxu0 %v4328_v51  ;;  %3787 = vmatprep.subr.bf16.mxu1 %v4329_v7 }
 0x2ab   : > { %3766 = vmatpush3.bf16.msra.mxu0 %v4330_v23  ;;  %3788 = vmatpush3.bf16.msra.mxu1 %v4331_v24 }
 0x2ac   : > { %3767 = vmatprep.subr.bf16.mxu0 %v4332_v25  ;;  %3789 = vmatprep.subr.bf16.mxu1 %v4333_v26 }
 0x2af   : > { %3768 = vmatpush3.bf16.msra.mxu0 %v4334_v27  ;;  %3790 = vmatpush3.bf16.msra.mxu1 %v4335_v29 }
 0x2b0   : > { %3769 = vmatprep.subr.bf16.mxu0 %v4336_v30  ;;  %3791 = vmatprep.subr.bf16.mxu1 %v4337_v32 }
 0x2b3   : > { %3770 = vmatpush3.bf16.msra.mxu0 %v4338_v33  ;;  %3792 = vmatpush3.bf16.msra.mxu1 %v4339_v34 }
 0x2b4   : > { %3771 = vmatprep.subr.bf16.mxu0 %v4340_v35  ;;  %3793 = vmatprep.subr.bf16.mxu1 %v4341_v36 }
 0x2b7   : > { %3772 = vmatpush3.bf16.msra.mxu0 %v4342_v43  ;;  %3794 = vmatpush3.bf16.msra.mxu1 %v4343_v44 }
 0x36d   : > { %v2622_v50 = vpop.f32.mrb[8].mxu0  ;;  %v2786_v5 = vpop.f32.mrb[8].mxu1 }
 0x36e   : > { %v3801_v31 = vadd.f32 %v2622_v50, %v1168_v46  ;;  %v3803_v52 = vadd.f32 %v2786_v5, %v1176_v47  ;;  %v2624_v53 = vpop.f32.mrb[9].mxu0  ;;  %v2788_v54 = vpop.f32.mrb[9].mxu1 }
 0x36f   : > { %v3802_v55 = vadd.f32 %v2624_v53, %v1172_v48  ;;  %v3804_v56 = vadd.f32 %v2788_v54, %v1180_v49  ;;  %v2626_v57 = vpop.f32.mrb[10].mxu0  ;;  %v2790_v58 = vpop.f32.mrb[10].mxu1 }
 0x370   : > { %vm2793_vm9 = vcmp.gt.f32.partialorder %v3801_v31, 0.0  ;;  %v2797_v39 = vmul.f32 0.01, %v3801_v31  ;;  %vm2795_vm10 = vcmp.gt.f32.partialorder %v3803_v52, 0.0  ;;  %v2799_v1 = vmul.f32 0.01, %v3803_v52 }
 0x371   : > { %vm2794_vm11 = vcmp.gt.f32.partialorder %v3802_v55, 0.0  ;;  %v2798_v59 = vmul.f32 0.01, %v3802_v55  ;;  %vm2796_vm12 = vcmp.gt.f32.partialorder %v3804_v56, 0.0  ;;  %v2800_v41 = vmul.f32 0.01, %v3804_v56 }
 0x372   : > { %v2801_v38 = vsel %vm2793_vm9, %v3801_v31, %v2797_v39  ;;  %v2803_v42 = vsel %vm2795_vm10, %v3803_v52, %v2799_v1  ;;  %v2627_v60 = vpop.f32.mrb[11].mxu0  ;;  %v2791_v61 = vpop.f32.mrb[11].mxu1 }
 0x373   : > { %v2802_v40 = vsel %vm2794_vm11, %v3802_v55, %v2798_v59  ;;  %v2804_v62 = vsel %vm2796_vm12, %v3804_v56, %v2800_v41  ;;  %v2805_v2 = vpack.c.bf16 %v2801_v38, %v2801_v38  ;;  %v2807_v28 = vpack.c.bf16 %v2803_v42, %v2803_v42 }
 0x374   : > { %v2806_v63 = vpack.c.bf16 %v2802_v40, %v2802_v40  ;;  %v2808_v0 = vpack.c.bf16 %v2804_v62, %v2804_v62 }
 0x376   : > { %3104 = vmatprep.mubr.bf16.mxu0 %v2806_v63  ;;  %3144 = vmatprep.mubr.bf16.mxu1 %v2808_v0 }
 0x377   : > { %3105 = vmatmul.mubr.bf16.vlgmr.msra.gmra.mrb[12].mxu0 %v2805_v2  ;;  %3145 = vmatmul.mubr.bf16.vlgmr.msra.gmra.mrb[12].mxu1 %v2807_v28 }
 0x44a   : > { %v3773_v3 = vpop.f32.mrb[12].mxu0  ;;  %v3795_v4 = vpop.f32.mrb[12].mxu1  ;;  %3155 = sbr.rel (%p3747_p0) target bundleno = 1424 (0x590), region = 84 }
 0x44b   : > { %v3774_v8 = vpop.f32.mrb[13].mxu0  ;;  %v3796_v9 = vpop.f32.mrb[13].mxu1 }
 0x44c   : > { %v3775_v10 = vadd.f32 %v3774_v8, %v3773_v3  ;;  %v3797_v11 = vadd.f32 %v3796_v9, %v3795_v4  ;;  %v3776_v12 = vpop.f32.mrb[14].mxu0  ;;  %v3798_v13 = vpop.f32.mrb[14].mxu1 }
 0x44d   : > { %v3777_v14 = vpop.f32.mrb[15].mxu0  ;;  %v3799_v15 = vpop.f32.mrb[15].mxu1 }
 0x44e   : > { %v3107_v16 = vadd.f32 %v3775_v10, %v3714_v6 }
 0x450   : > { %v3147_v17 = vadd.f32 %v3797_v11, %v3107_v16 }
 0x452   : > { %v3160_v20 = vmul.f32 %v3159_v19, %v3147_v17 }
 0x454   : > { %v3161_v21 = vsel %vm3158_vm13, %v3160_v20, -1e+30 }
 0x455   : > { %3162 = vmax.xlane.f32.xlu0 %v3161_v21  ;;  %3172 = vst [vmem:[%s5005_s21] sm:$0xff] %v3161_v21 }
 0x4e2   : > { %v3163_v22 = vpop.xlane.xlu0 %3162 }
 0x4e3   : > { %v3164_v51 = vsub.f32 %v3161_v21, %v3163_v22 }
 0x4e5   : > { %v3165_v7 = vmul.f32 1.442695, %v3164_v51 }
 0x4e7   : > { %4344 = vpow2.f32 %v3165_v7 }
 0x4f1   : > { %v4345_v23 = vpop.eup %4344 }
 0x4f2   : > { %3167 = vadd.xlane.f32.xlu0 %v4345_v23 }
 0x57f   : > { %v3168_v24 = vpop.xlane.xlu0 %3167 }
 0x580   : > { %4346 = vlog2.f32 %v3168_v24 }
 0x58a   : > { %v4347_v25 = vpop.eup %4346 }
 0x58b   : > { %v3170_v37 = vmul.f32 0.6931472, %v4347_v25 }
 0x58d   : > { %v3171_v26 = vsub.f32 %v3164_v51, %v3170_v37 }
 0x58f   : > { %3173 = vst [vmem:[%s5005_s21 + $0x8] sm:$0xff] %v3171_v26 }
 0x590 PF: > { %p3748_p5 = scmp.ne.s32.totalorder %s4610_s30, 1 }
 0x591   : > { %3178 = vst [vmem:[%s5005_s21] sm:$0xff] (!%p3748_p5), %v3147_v17  ;;  %v4634_v27 = vmov (!%p3748_p5), 0.0  }
 0x592   : > { %3177 = sbr.rel (%p3748_p5) target bundleno = 1433 (0x599), region = 88  ;;  %3179 = vst [vmem:[%s5005_s21 + $0x8] sm:$0xff] (!%p3748_p5), %v4634_v27 }
 0x599 PF: > { %s28_s10 = sadd.s32 1, %s4618_s10   ;;  %s5449_s22 = sld [smem:[#allocation17_spill]] }
 0x59a   : > { %p25_p6 = scmp.ge.s32.totalorder %s28_s10, 4   ;;  %s5450_s29 = sld [smem:[#allocation19_spill]] }
 0x59b   : > { %s5451_s14 = sld [smem:[#allocation18_spill]]  ;;  %s5452_s27 = smov %s4602_s28 }
 0x59c   : > { %s5454_s30 = smov %s4614_s9  ;;  %27 = sbr.rel (!%p25_p6) target bundleno = 14 (0xe), region = 168 }
 0x59f   : > { %s5453_s28 = smov %s5449_s22 }
 0x5a1   : > { %s5455_s9 = smov %s5451_s14 }
 0x5a3   :  { %3209 = vsyncpa [#allocation3], 1 }
 0x5a4   :  { %3211 = vsyncpa [#allocation3 + $0x1], 1 }
 0x5a5   :  { %3212 = vsyncpa [#allocation5], 1 }
 0x5a6   :  { %3214 = vsyncpa [#allocation5 + $0x1], 1 }
 0x5a7   :  { %3215 = vsyncpa [#allocation8], 1 }
 0x5a8   :  { %3217 = vsyncpa [#allocation8 + $0x1], 1 }
 0x5a9   :  { %3218 = vsyncpa [#allocation11], 1 }
 0x5aa   :  { %3220 = vsyncpa [#allocation11 + $0x1], 1 }

</bundles_post_ra>
